<compile_context>
chip_gen: v7x
topology: tpu7x:2x2x1
jax: 0.10.0
libtpu: 0.0.40
codegen_flags: <defaults>
</compile_context>

<pallas_src>
import jax
import jax.numpy as jnp
from jax.experimental import pallas as pl
from jax.experimental.pallas import tpu as pltpu


def _vae_decoder_kernel(x_ref, w1_ref, b1_ref, w2_ref, b2_ref,
                        w3_ref, b3_ref, w4_ref, b4_ref, o_ref):
    """Fused MLP decoder: 3x (Linear + ReLU) + Linear + sigmoid on one batch tile.

    Matmul inputs are bf16, accumulation is f32; biases / epilogue are f32.
    """
    # Layer 1: (TB, z) @ (z, 128) + b1 -> ReLU   (hidden 100 zero-padded to 128)
    h = jnp.dot(x_ref[...], w1_ref[...], preferred_element_type=jnp.float32)
    h = jnp.maximum(h + b1_ref[...], 0.0)
    # Layer 2: (TB, 128) @ (128, 256) + b2 -> ReLU
    h = jnp.dot(h.astype(w2_ref.dtype), w2_ref[...],
                preferred_element_type=jnp.float32)
    h = jnp.maximum(h + b2_ref[...], 0.0)
    # Layer 3: (TB, 256) @ (256, 512) + b3 -> ReLU
    h = jnp.dot(h.astype(w3_ref.dtype), w3_ref[...],
                preferred_element_type=jnp.float32)
    h = jnp.maximum(h + b3_ref[...], 0.0)
    # Layer 4: (TB, 512) @ (512, in_dim) + b4 -> sigmoid
    h = jnp.dot(h.astype(w4_ref.dtype), w4_ref[...],
                preferred_element_type=jnp.float32)
    h = h + b4_ref[...]
    # sigmoid(h) = 1 / (1 + exp(-h)); exp and approx reciprocal both run on
    # the EUP slot, keeping the VALU free in the epilogue.
    e = jnp.exp(-h)
    o_ref[...] = pl.reciprocal(1.0 + e, approx=True).astype(o_ref.dtype)


def vae_decoder_forward(x, params, *, block_b=256):
    """Pallas equivalent of VaeDecoder(in_dim, z_dim).forward(x).

    x:       (B, z_dim) float32
    params:  (W1, b1, W2, b2, W3, b3, W4, b4) with Wk of shape (fan_in, fan_out)
    """
    w1, b1, w2, b2, w3, b3, w4, b4 = params
    B, z_dim = x.shape
    in_dim = w4.shape[1]
    out_dtype = x.dtype

    # ---- Wrapper-side prep (exact, one-time) --------------------------------
    # Zero-pad hidden width 100 -> 128 (lane-aligned layer-1 output and a clean
    # K=128 contraction into layer 2).
    h1 = w1.shape[1]
    h1_pad = (-h1) % 128
    if h1_pad:
        w1 = jnp.pad(w1, ((0, 0), (0, h1_pad)))
        b1 = jnp.pad(b1, (0, h1_pad))
        w2 = jnp.pad(w2, ((0, h1_pad), (0, 0)))

    # bf16 matmul inputs (f32 accumulation inside the kernel); biases stay f32.
    xb = x.astype(jnp.bfloat16)
    w1b, w2b, w3b, w4b = (w.astype(jnp.bfloat16) for w in (w1, w2, w3, w4))

    # Biases as (1, N) f32 rows: 2-D, lane-dense, broadcast cleanly in-kernel.
    b1r, b2r, b3r, b4r = (b.astype(jnp.float32).reshape(1, -1)
                          for b in (b1, b2, b3, b4))

    # ---- Grid / specs -------------------------------------------------------
    # Large batch tile: full MXU height, minimal grid steps. Small B (e.g. the
    # demo's 32) becomes a single grid step, so weights are fetched exactly once.
    block_b = min(block_b, B)
    grid = (pl.cdiv(B, block_b),)

    def batch_spec(cols):
        return pl.BlockSpec((block_b, cols), lambda i: (i, 0))

    def resident_spec(arr):
        # Full-array block, same block index every grid step -> stays in VMEM.
        return pl.BlockSpec(arr.shape, lambda i: (0, 0))

    return pl.pallas_call(
        _vae_decoder_kernel,
        out_shape=jax.ShapeDtypeStruct((B, in_dim), out_dtype),
        grid=grid,
        in_specs=[
            batch_spec(z_dim),
            resident_spec(w1b), resident_spec(b1r),
            resident_spec(w2b), resident_spec(b2r),
            resident_spec(w3b), resident_spec(b3r),
            resident_spec(w4b), resident_spec(b4r),
        ],
        out_specs=batch_spec(in_dim),
        compiler_params=pltpu.CompilerParams(
            # Batch tiles shard across TensorCores on v7x; neutral on v5e/v6e.
            dimension_semantics=("parallel",),
        ),
    )(xb, w1b, b1r, w2b, b2r, w3b, b3r, w4b, b4r)


def _reference(x, params):
    """Pure-JAX f32 reference matching torch semantics."""
    w1, b1, w2, b2, w3, b3, w4, b4 = params
    h = jax.nn.relu(x @ w1 + b1)
    h = jax.nn.relu(h @ w2 + b2)
    h = jax.nn.relu(h @ w3 + b3)
    return jax.nn.sigmoid(h @ w4 + b4)


def _init_params(key, z_dim, in_dim, dtype=jnp.float32):
    """Deterministic torch-style init: U(-1/sqrt(fan_in), 1/sqrt(fan_in))."""
    dims = [(z_dim, 100), (100, 256), (256, 512), (512, in_dim)]
    params = []
    for fan_in, fan_out in dims:
        key, kw, kb = jax.random.split(key, 3)
        bound = 1.0 / jnp.sqrt(jnp.float32(fan_in))
        w = jax.random.uniform(kw, (fan_in, fan_out), dtype, -bound, bound)
        b = jax.random.uniform(kb, (fan_out,), dtype, -bound, bound)
        params += [w, b]
    return tuple(params)


if __name__ == "__main__":
    key = jax.random.PRNGKey(0)
    k_x, k_p = jax.random.split(key)

    # Small shapes consistent with the module: batch=32, latent z_dim=8,
    # reconstructed in_dim=784 (MNIST-style flattened image).
    batch, z_dim, in_dim = 32, 8, 784
    x = jax.random.normal(k_x, (batch, z_dim), dtype=jnp.float32)
    params = _init_params(k_p, z_dim, in_dim)

    y = vae_decoder_forward(x, params)
    y = jax.block_until_ready(y)

    ref = _reference(x, params)
    assert y.shape == ref.shape == (batch, in_dim), (y.shape, ref.shape)
    assert y.dtype == ref.dtype
    assert bool(jnp.all(jnp.isfinite(y)))
    # bf16 matmul inputs (f32 accumulation) + approx reciprocal: output is a
    # sigmoid in [0, 1], errors stay well under 1e-2 absolute.
    assert bool(jnp.allclose(y, ref, atol=1e-2, rtol=1e-2)), float(
        jnp.max(jnp.abs(y - ref)))

    print("KERNEL_OK")
</pallas_src>

<mosaic_0001>
module attributes {stable_mosaic.version = 11 : i64} {
  func.func @_vae_decoder_kernel(%arg0: i32, %arg1: memref<32x8xbf16, #tpu.memory_space<vmem>>, %arg2: memref<8x128xbf16, #tpu.memory_space<vmem>>, %arg3: memref<1x128xf32, #tpu.memory_space<vmem>>, %arg4: memref<128x256xbf16, #tpu.memory_space<vmem>>, %arg5: memref<1x256xf32, #tpu.memory_space<vmem>>, %arg6: memref<256x512xbf16, #tpu.memory_space<vmem>>, %arg7: memref<1x512xf32, #tpu.memory_space<vmem>>, %arg8: memref<512x784xbf16, #tpu.memory_space<vmem>>, %arg9: memref<1x784xf32, #tpu.memory_space<vmem>>, %arg10: memref<32x784xf32, #tpu.memory_space<vmem>>) attributes {dimension_semantics = [#tpu.dimension_semantics<parallel>], iteration_bounds = array<i64: 1>, scalar_prefetch = 0 : i64, scratch_operands = 0 : i64, tpu.core_type = #tpu.core_type<tc>, window_params = [{transform_indices = @transform_0, window_bounds = array<i64: 32, 8>}, {pipeline_mode = #tpu.pipeline_mode<synchronous>, transform_indices = @transform_1, window_bounds = array<i64: 8, 128>}, {pipeline_mode = #tpu.pipeline_mode<synchronous>, transform_indices = @transform_2, window_bounds = array<i64: 1, 128>}, {pipeline_mode = #tpu.pipeline_mode<synchronous>, transform_indices = @transform_3, window_bounds = array<i64: 128, 256>}, {pipeline_mode = #tpu.pipeline_mode<synchronous>, transform_indices = @transform_4, window_bounds = array<i64: 1, 256>}, {pipeline_mode = #tpu.pipeline_mode<synchronous>, transform_indices = @transform_5, window_bounds = array<i64: 256, 512>}, {pipeline_mode = #tpu.pipeline_mode<synchronous>, transform_indices = @transform_6, window_bounds = array<i64: 1, 512>}, {pipeline_mode = #tpu.pipeline_mode<synchronous>, transform_indices = @transform_7, window_bounds = array<i64: 512, 784>}, {pipeline_mode = #tpu.pipeline_mode<synchronous>, transform_indices = @transform_8, window_bounds = array<i64: 1, 784>}, {transform_indices = @transform_9, window_bounds = array<i64: 32, 784>}]} {
    %c0 = arith.constant 0 : index
    %c0_0 = arith.constant 0 : index
    %0 = vector.load %arg1[%c0, %c0_0] : memref<32x8xbf16, #tpu.memory_space<vmem>>, vector<32x8xbf16>
    %c0_1 = arith.constant 0 : index
    %c0_2 = arith.constant 0 : index
    %1 = vector.load %arg2[%c0_1, %c0_2] : memref<8x128xbf16, #tpu.memory_space<vmem>>, vector<8x128xbf16>
    %cst = arith.constant dense<0.000000e+00> : vector<32x128xf32>
    %2 = tpu.matmul %0, %1, %cst {dimension_numbers = #tpu.dot_dimension_numbers<[1], [0], [0], [1], [0, 0, 1, 1], [], []>} : vector<32x8xbf16>, vector<8x128xbf16>, vector<32x128xf32> -> vector<32x128xf32>
    %c0_3 = arith.constant 0 : index
    %c0_4 = arith.constant 0 : index
    %3 = vector.load %arg3[%c0_3, %c0_4] : memref<1x128xf32, #tpu.memory_space<vmem>>, vector<1x128xf32>
    %4 = vector.broadcast %3 : vector<1x128xf32> to vector<32x128xf32>
    %5 = arith.addf %2, %4 : vector<32x128xf32>
    %cst_5 = arith.constant 0.000000e+00 : f32
    %6 = vector.broadcast %cst_5 : f32 to vector<32x128xf32>
    %7 = arith.maximumf %5, %6 : vector<32x128xf32>
    %8 = arith.truncf %7 : vector<32x128xf32> to vector<32x128xbf16>
    %c0_6 = arith.constant 0 : index
    %c0_7 = arith.constant 0 : index
    %9 = vector.load %arg4[%c0_6, %c0_7] : memref<128x256xbf16, #tpu.memory_space<vmem>>, vector<128x256xbf16>
    %cst_8 = arith.constant dense<0.000000e+00> : vector<32x256xf32>
    %10 = tpu.matmul %8, %9, %cst_8 {dimension_numbers = #tpu.dot_dimension_numbers<[1], [0], [0], [1], [0, 0, 1, 1], [], []>} : vector<32x128xbf16>, vector<128x256xbf16>, vector<32x256xf32> -> vector<32x256xf32>
    %c0_9 = arith.constant 0 : index
    %c0_10 = arith.constant 0 : index
    %11 = vector.load %arg5[%c0_9, %c0_10] : memref<1x256xf32, #tpu.memory_space<vmem>>, vector<1x256xf32>
    %12 = vector.broadcast %11 : vector<1x256xf32> to vector<32x256xf32>
    %13 = arith.addf %10, %12 : vector<32x256xf32>
    %cst_11 = arith.constant 0.000000e+00 : f32
    %14 = vector.broadcast %cst_11 : f32 to vector<32x256xf32>
    %15 = arith.maximumf %13, %14 : vector<32x256xf32>
    %16 = arith.truncf %15 : vector<32x256xf32> to vector<32x256xbf16>
    %c0_12 = arith.constant 0 : index
    %c0_13 = arith.constant 0 : index
    %17 = vector.load %arg6[%c0_12, %c0_13] : memref<256x512xbf16, #tpu.memory_space<vmem>>, vector<256x512xbf16>
    %cst_14 = arith.constant dense<0.000000e+00> : vector<32x512xf32>
    %18 = tpu.matmul %16, %17, %cst_14 {dimension_numbers = #tpu.dot_dimension_numbers<[1], [0], [0], [1], [0, 0, 1, 1], [], []>} : vector<32x256xbf16>, vector<256x512xbf16>, vector<32x512xf32> -> vector<32x512xf32>
    %c0_15 = arith.constant 0 : index
    %c0_16 = arith.constant 0 : index
    %19 = vector.load %arg7[%c0_15, %c0_16] : memref<1x512xf32, #tpu.memory_space<vmem>>, vector<1x512xf32>
    %20 = vector.broadcast %19 : vector<1x512xf32> to vector<32x512xf32>
    %21 = arith.addf %18, %20 : vector<32x512xf32>
    %cst_17 = arith.constant 0.000000e+00 : f32
    %22 = vector.broadcast %cst_17 : f32 to vector<32x512xf32>
    %23 = arith.maximumf %21, %22 : vector<32x512xf32>
    %24 = arith.truncf %23 : vector<32x512xf32> to vector<32x512xbf16>
    %c0_18 = arith.constant 0 : index
    %c0_19 = arith.constant 0 : index
    %25 = vector.load %arg8[%c0_18, %c0_19] : memref<512x784xbf16, #tpu.memory_space<vmem>>, vector<512x784xbf16>
    %cst_20 = arith.constant dense<0.000000e+00> : vector<32x784xf32>
    %26 = tpu.matmul %24, %25, %cst_20 {dimension_numbers = #tpu.dot_dimension_numbers<[1], [0], [0], [1], [0, 0, 1, 1], [], []>} : vector<32x512xbf16>, vector<512x784xbf16>, vector<32x784xf32> -> vector<32x784xf32>
    %c0_21 = arith.constant 0 : index
    %c0_22 = arith.constant 0 : index
    %27 = vector.load %arg9[%c0_21, %c0_22] : memref<1x784xf32, #tpu.memory_space<vmem>>, vector<1x784xf32>
    %28 = vector.broadcast %27 : vector<1x784xf32> to vector<32x784xf32>
    %29 = arith.addf %26, %28 : vector<32x784xf32>
    %cst_23 = arith.constant 0.000000e+00 : f32
    %30 = vector.broadcast %cst_23 : f32 to vector<32x784xf32>
    %31 = arith.subf %30, %29 : vector<32x784xf32>
    %32 = math.exp %31 : vector<32x784xf32>
    %cst_24 = arith.constant 1.000000e+00 : f32
    %33 = vector.broadcast %cst_24 : f32 to vector<32x784xf32>
    %34 = arith.addf %33, %32 : vector<32x784xf32>
    %35 = tpu.reciprocal %34 {approx = true} : vector<32x784xf32> -> vector<32x784xf32>
    %c0_25 = arith.constant 0 : index
    %c0_26 = arith.constant 0 : index
    %36 = vector.load %arg10[%c0_25, %c0_26] : memref<32x784xf32, #tpu.memory_space<vmem>>, vector<32x784xf32>
    tpu.vector_store %arg10[%c0_25, %c0_26], %35 {strides = array<i32>} : memref<32x784xf32, #tpu.memory_space<vmem>>, vector<32x784xf32>,
    return
  }
  func.func @transform_0(%arg0: i32) -> (i32, i32) {
    %c0_i32 = arith.constant 0 : i32
    %c0_i32_0 = arith.constant 0 : i32
    return %arg0, %c0_i32 : i32, i32
  }
  func.func @transform_1(%arg0: i32) -> (i32, i32) {
    %c0_i32 = arith.constant 0 : i32
    %c0_i32_0 = arith.constant 0 : i32
    %c0_i32_1 = arith.constant 0 : i32
    return %c0_i32, %c0_i32_0 : i32, i32
  }
  func.func @transform_2(%arg0: i32) -> (i32, i32) {
    %c0_i32 = arith.constant 0 : i32
    %c0_i32_0 = arith.constant 0 : i32
    %c0_i32_1 = arith.constant 0 : i32
    return %c0_i32, %c0_i32_0 : i32, i32
  }
  func.func @transform_3(%arg0: i32) -> (i32, i32) {
    %c0_i32 = arith.constant 0 : i32
    %c0_i32_0 = arith.constant 0 : i32
    %c0_i32_1 = arith.constant 0 : i32
    return %c0_i32, %c0_i32_0 : i32, i32
  }
  func.func @transform_4(%arg0: i32) -> (i32, i32) {
    %c0_i32 = arith.constant 0 : i32
    %c0_i32_0 = arith.constant 0 : i32
    %c0_i32_1 = arith.constant 0 : i32
    return %c0_i32, %c0_i32_0 : i32, i32
  }
  func.func @transform_5(%arg0: i32) -> (i32, i32) {
    %c0_i32 = arith.constant 0 : i32
    %c0_i32_0 = arith.constant 0 : i32
    %c0_i32_1 = arith.constant 0 : i32
    return %c0_i32, %c0_i32_0 : i32, i32
  }
  func.func @transform_6(%arg0: i32) -> (i32, i32) {
    %c0_i32 = arith.constant 0 : i32
    %c0_i32_0 = arith.constant 0 : i32
    %c0_i32_1 = arith.constant 0 : i32
    return %c0_i32, %c0_i32_0 : i32, i32
  }
  func.func @transform_7(%arg0: i32) -> (i32, i32) {
    %c0_i32 = arith.constant 0 : i32
    %c0_i32_0 = arith.constant 0 : i32
    %c0_i32_1 = arith.constant 0 : i32
    return %c0_i32, %c0_i32_0 : i32, i32
  }
  func.func @transform_8(%arg0: i32) -> (i32, i32) {
    %c0_i32 = arith.constant 0 : i32
    %c0_i32_0 = arith.constant 0 : i32
    %c0_i32_1 = arith.constant 0 : i32
    return %c0_i32, %c0_i32_0 : i32, i32
  }
  func.func @transform_9(%arg0: i32) -> (i32, i32) {
    %c0_i32 = arith.constant 0 : i32
    %c0_i32_0 = arith.constant 0 : i32
    return %arg0, %c0_i32 : i32, i32
  }
}

</mosaic_0001>

<bundles_post_ra>
// kernel: tpu_custom_call.1
= control target key start
LH: loop header
LB: loop body
LE: loop exit
PB: predicated region body
PF: predicated region fallthrough
CT: control target
= control target key end

     0   :  { %vm63_vm0 = vcmask 1043456   ;;  %vm56_vm1 = vcmask 64512   ;;  %v3882_v20 = vmov 0   ;;  %s4985_s0 = inlined_call_operand.vmem [shape: bf16[32,8], index: 0, kind: input, shape index: {}]   ;;  %s4986_s1 = inlined_call_operand.vmem [shape: bf16[8,128], index: 1, kind: input, shape index: {}]   ;;  %s4987_s2 = inlined_call_operand.vmem [shape: f32[1,128], index: 2, kind: input, shape index: {}]   ;;  %s4988_s3 = inlined_call_operand.vmem [shape: bf16[128,256], index: 3, kind: input, shape index: {}]   ;;  %s4989_s4 = inlined_call_operand.vmem [shape: f32[1,256], index: 4, kind: input, shape index: {}]   ;;  %s4990_s5 = inlined_call_operand.vmem [shape: bf16[256,512], index: 5, kind: input, shape index: {}]   ;;  %s4991_s6 = inlined_call_operand.vmem [shape: f32[1,512], index: 6, kind: input, shape index: {}]   ;;  %s4992_s7 = inlined_call_operand.vmem [shape: bf16[512,784], index: 7, kind: input, shape index: {}]   ;;  %s4993_s8 = inlined_call_operand.vmem [shape: f32[1,784], index: 8, kind: input, shape index: {}]   ;;  %s4994_s9 = inlined_call_operand.hbm [shape: f32[32,784], index: 9, kind: output, shape index: {}]  }
   0x1   :  { %v38_v0 = vld [vmem:[%s4986_s1] sm:$0xf]  ;;  %v3305_v3 = vld [vmem:[%s4985_s0 + $0x8] sm:$0xff]   ;;  %v3311_v6 = vld [vmem:[%s4988_s3 + $0x14] ss:$8 sps:$4 sm:$0xff]  }
   0x2   :  { %v3304_v1 = vld [vmem:[%s4985_s0] sm:$0xff]   ;;  %3299 = vmatprep.subr.msk.bf16.mxu1 %vm63_vm0, %v38_v0  ;;  %v65_v2 = vsel %vm63_vm0, %v38_v0, 0  ;;  %v3309_v7 = vld [vmem:[%s4988_s3 + $0x10] ss:$8 sps:$4 sm:$0xff]   ;;  %v3317_v10 = vld [vmem:[%s4988_s3 + $0x34] ss:$8 sps:$4 sm:$0xff]  }
   0x3   :  { %3246 = vmatpush3.bf16.msra.mxu1 %v65_v2  ;;  %3247 = vmatprep.mubr.msk.bf16.mxu1 %vm56_vm1, %v3304_v1  ;;  %v3306_v4 = vld [vmem:[%s4988_s3] ss:$8 sps:$4 sm:$0xff]   ;;  %v3308_v5 = vld [vmem:[%s4988_s3 + $0x4] ss:$8 sps:$4 sm:$0xff]   ;;  %v3315_v11 = vld [vmem:[%s4988_s3 + $0x30] ss:$8 sps:$4 sm:$0xff]  }
   0x4   :  { %230 = vmatprep.subr.bf16.mxu1 %v3308_v5  ;;  %v3314_v8 = vld [vmem:[%s4988_s3 + $0x24] ss:$8 sps:$4 sm:$0xff]   ;;  %v3312_v9 = vld [vmem:[%s4988_s3 + $0x20] ss:$8 sps:$4 sm:$0xff]   ;;  %v3323_v14 = vld [vmem:[%s4988_s3 + $0x54] ss:$8 sps:$4 sm:$0xff]  }
   0x5   :  { %v3320_v12 = vld [vmem:[%s4988_s3 + $0x44] ss:$8 sps:$4 sm:$0xff]   ;;  %v3318_v13 = vld [vmem:[%s4988_s3 + $0x40] ss:$8 sps:$4 sm:$0xff]   ;;  %v3321_v15 = vld [vmem:[%s4988_s3 + $0x50] ss:$8 sps:$4 sm:$0xff]  }
   0x6   :  { %3248 = vmatmul.mubr.msk.bf16.vlgmr.msra.gmra.mrb[0].mxu1 %vm56_vm1, %v3305_v3  ;;  %v3326_v16 = vld [vmem:[%s4988_s3 + $0x64] ss:$8 sps:$4 sm:$0xff]   ;;  %v3324_v17 = vld [vmem:[%s4988_s3 + $0x60] ss:$8 sps:$4 sm:$0xff]   ;;  %v3329_v18 = vld [vmem:[%s4988_s3 + $0x74] ss:$8 sps:$4 sm:$0xff]  }
   0x7   :  { %231 = vmatpush1.bf16.msra.mxu1 %v3306_v4  ;;  %v3327_v19 = vld [vmem:[%s4988_s3 + $0x70] ss:$8 sps:$4 sm:$0xff]   ;;  %262 = vmatprep.mubr.bf16.mxu1 %v3882_v20  ;;  %v3330_v21 = vld [vmem:[%s4990_s5 + $0x4] ss:$16 sps:$4 sm:$0xff]   ;;  %v3334_v22 = vld [vmem:[%s4990_s5 + $0xc] ss:$16 sps:$4 sm:$0xff]  }
   0x8   :  { %232 = vmatprep.subr.bf16.mxu1 %v3311_v6  ;;  %v3335_v23 = vld [vmem:[%s4990_s5] ss:$16 sps:$4 sm:$0xff]   ;;  %v3336_v24 = vld [vmem:[%s4990_s5 + $0x24] ss:$16 sps:$4 sm:$0xff]   ;;  %701 = vmatprep.subr.bf16.mxu0 %v3330_v21 }
   0x9   :  { %702 = vmatpush1.bf16.msra.mxu0 %v3335_v23  ;;  %v3341_v25 = vld [vmem:[%s4990_s5 + $0x20] ss:$16 sps:$4 sm:$0xff]   ;;  %v3342_v26 = vld [vmem:[%s4990_s5 + $0x44] ss:$16 sps:$4 sm:$0xff]  }
   0xa   :  { %703 = vmatprep.subr.bf16.mxu0 %v3336_v24  ;;  %v3347_v27 = vld [vmem:[%s4990_s5 + $0x40] ss:$16 sps:$4 sm:$0xff]   ;;  %v3348_v28 = vld [vmem:[%s4990_s5 + $0x64] ss:$16 sps:$4 sm:$0xff]  }
   0xb   :  { %233 = vmatpush1.bf16.msra.mxu1 %v3309_v7  ;;  %v3353_v29 = vld [vmem:[%s4990_s5 + $0x60] ss:$16 sps:$4 sm:$0xff]   ;;  %v3354_v30 = vld [vmem:[%s4990_s5 + $0x84] ss:$16 sps:$4 sm:$0xff]  }
   0xc   :  { %234 = vmatprep.subr.bf16.mxu1 %v3314_v8  ;;  %v3359_v31 = vld [vmem:[%s4990_s5 + $0x80] ss:$16 sps:$4 sm:$0xff]   ;;  %v3360_v32 = vld [vmem:[%s4990_s5 + $0xa4] ss:$16 sps:$4 sm:$0xff]  }
   0xd   :  { %704 = vmatpush1.bf16.msra.mxu0 %v3341_v25  ;;  %v3365_v33 = vld [vmem:[%s4990_s5 + $0xa0] ss:$16 sps:$4 sm:$0xff]   ;;  %v3366_v34 = vld [vmem:[%s4990_s5 + $0xc4] ss:$16 sps:$4 sm:$0xff]  }
   0xe   :  { %705 = vmatprep.subr.bf16.mxu0 %v3342_v26  ;;  %v3371_v35 = vld [vmem:[%s4990_s5 + $0xc0] ss:$16 sps:$4 sm:$0xff]   ;;  %v3372_v36 = vld [vmem:[%s4990_s5 + $0xe4] ss:$16 sps:$4 sm:$0xff]  }
   0xf   :  { %235 = vmatpush1.bf16.msra.mxu1 %v3312_v9  ;;  %v3377_v37 = vld [vmem:[%s4990_s5 + $0xe0] ss:$16 sps:$4 sm:$0xff]  }
  0x10   :  { %236 = vmatprep.subr.bf16.mxu1 %v3317_v10 }
  0x11   :  { %706 = vmatpush1.bf16.msra.mxu0 %v3347_v27 }
  0x12   :  { %707 = vmatprep.subr.bf16.mxu0 %v3348_v28 }
  0x13   :  { %237 = vmatpush1.bf16.msra.mxu1 %v3315_v11 }
  0x14   :  { %238 = vmatprep.subr.bf16.mxu1 %v3320_v12 }
  0x15   :  { %708 = vmatpush1.bf16.msra.mxu0 %v3353_v29 }
  0x16   :  { %709 = vmatprep.subr.bf16.mxu0 %v3354_v30 }
  0x17   :  { %239 = vmatpush1.bf16.msra.mxu1 %v3318_v13 }
  0x18   :  { %240 = vmatprep.subr.bf16.mxu1 %v3323_v14 }
  0x19   :  { %710 = vmatpush1.bf16.msra.mxu0 %v3359_v31 }
  0x1a   :  { %711 = vmatprep.subr.bf16.mxu0 %v3360_v32 }
  0x1b   :  { %241 = vmatpush1.bf16.msra.mxu1 %v3321_v15 }
  0x1c   :  { %242 = vmatprep.subr.bf16.mxu1 %v3326_v16 }
  0x1d   :  { %712 = vmatpush1.bf16.msra.mxu0 %v3365_v33 }
  0x1e   :  { %713 = vmatprep.subr.bf16.mxu0 %v3366_v34 }
  0x1f   :  { %243 = vmatpush1.bf16.msra.mxu1 %v3324_v17 }
  0x20   :  { %244 = vmatprep.subr.bf16.mxu1 %v3329_v18 }
  0x21   :  { %714 = vmatpush1.bf16.msra.mxu0 %v3371_v35 }
  0x23   :  { %245 = vmatpush1.bf16.msra.mxu1 %v3327_v19 }
  0x24   :  { %754 = vmatprep.subr.bf16.mxu1 %v3334_v22 }
  0x25   :  { %14 = vsyncpa [#allocation3], 0  ;;  %715 = vmatprep.subr.bf16.mxu0 %v3372_v36  ;;  %v3378_v38 = vld [vmem:[%s4990_s5 + $0x104] ss:$16 sps:$4 sm:$0xff]   ;;  %v3383_v39 = vld [vmem:[%s4990_s5 + $0x100] ss:$16 sps:$4 sm:$0xff]  }
  0x26   :  { %716 = vmatpush1.bf16.msra.mxu0 %v3377_v37  ;;  %v3384_v40 = vld [vmem:[%s4990_s5 + $0x124] ss:$16 sps:$4 sm:$0xff]   ;;  %v3389_v41 = vld [vmem:[%s4990_s5 + $0x120] ss:$16 sps:$4 sm:$0xff]   ;;  %v3332_v63 = vld [vmem:[%s4990_s5 + $0x8] ss:$16 sps:$4 sm:$0xff]  }
  0x27   :  { %717 = vmatprep.subr.bf16.mxu0 %v3378_v38  ;;  %v3390_v42 = vld [vmem:[%s4990_s5 + $0x144] ss:$16 sps:$4 sm:$0xff]   ;;  %v3395_v43 = vld [vmem:[%s4990_s5 + $0x140] ss:$16 sps:$4 sm:$0xff]   ;;  %v3340_v1 = vld [vmem:[%s4990_s5 + $0x2c] ss:$16 sps:$4 sm:$0xff]   ;;  %v140_v38 = vlaneseq }
  0x28   :  { %v3396_v44 = vld [vmem:[%s4990_s5 + $0x164] ss:$16 sps:$4 sm:$0xff]   ;;  %v3401_v45 = vld [vmem:[%s4990_s5 + $0x160] ss:$16 sps:$4 sm:$0xff]   ;;  %v3338_v2 = vld [vmem:[%s4990_s5 + $0x28] ss:$16 sps:$4 sm:$0xff]  }
  0x29   :  { %v3402_v46 = vld [vmem:[%s4990_s5 + $0x184] ss:$16 sps:$4 sm:$0xff]   ;;  %v3407_v47 = vld [vmem:[%s4990_s5 + $0x180] ss:$16 sps:$4 sm:$0xff]   ;;  %v3346_v3 = vld [vmem:[%s4990_s5 + $0x4c] ss:$16 sps:$4 sm:$0xff]  }
  0x2a   :  { %718 = vmatpush1.bf16.msra.mxu0 %v3383_v39  ;;  %v3408_v48 = vld [vmem:[%s4990_s5 + $0x1a4] ss:$16 sps:$4 sm:$0xff]   ;;  %v2877_v49 = vld [vmem:[%s4987_s2] ss:$0 sm:$0xff]  ;;  %v3344_v4 = vld [vmem:[%s4990_s5 + $0x48] ss:$16 sps:$4 sm:$0xff]  }
  0x2b   :  { %719 = vmatprep.subr.bf16.mxu0 %v3384_v40  ;;  %v3352_v5 = vld [vmem:[%s4990_s5 + $0x6c] ss:$16 sps:$4 sm:$0xff]   ;;  %v3350_v6 = vld [vmem:[%s4990_s5 + $0x68] ss:$16 sps:$4 sm:$0xff]   ;;  %v3413_v27 = vld [vmem:[%s4990_s5 + $0x1a0] ss:$16 sps:$4 sm:$0xff]  }
  0x2c   :  { %v3358_v7 = vld [vmem:[%s4990_s5 + $0x8c] ss:$16 sps:$4 sm:$0xff]   ;;  %v3356_v8 = vld [vmem:[%s4990_s5 + $0x88] ss:$16 sps:$4 sm:$0xff]   ;;  %v3414_v28 = vld [vmem:[%s4990_s5 + $0x1c4] ss:$16 sps:$4 sm:$0xff]  }
  0x2d   :  { %v3364_v9 = vld [vmem:[%s4990_s5 + $0xac] ss:$16 sps:$4 sm:$0xff]   ;;  %v3362_v10 = vld [vmem:[%s4990_s5 + $0xa8] ss:$16 sps:$4 sm:$0xff]   ;;  %v3419_v31 = vld [vmem:[%s4990_s5 + $0x1c0] ss:$16 sps:$4 sm:$0xff]  }
  0x2e   :  { %720 = vmatpush1.bf16.msra.mxu0 %v3389_v41  ;;  %v3370_v11 = vld [vmem:[%s4990_s5 + $0xcc] ss:$16 sps:$4 sm:$0xff]   ;;  %v3368_v12 = vld [vmem:[%s4990_s5 + $0xc8] ss:$16 sps:$4 sm:$0xff]   ;;  %v3420_v32 = vld [vmem:[%s4990_s5 + $0x1e4] ss:$16 sps:$4 sm:$0xff]  }
  0x2f   :  { %721 = vmatprep.subr.bf16.mxu0 %v3390_v42  ;;  %v3376_v13 = vld [vmem:[%s4990_s5 + $0xec] ss:$16 sps:$4 sm:$0xff]   ;;  %v3374_v14 = vld [vmem:[%s4990_s5 + $0xe8] ss:$16 sps:$4 sm:$0xff]   ;;  %v3425_v35 = vld [vmem:[%s4990_s5 + $0x1e0] ss:$16 sps:$4 sm:$0xff]  }
  0x30   :  { %v3382_v15 = vld [vmem:[%s4990_s5 + $0x10c] ss:$16 sps:$4 sm:$0xff]   ;;  %v3380_v16 = vld [vmem:[%s4990_s5 + $0x108] ss:$16 sps:$4 sm:$0xff]   ;;  %v3428_v36 = vld [vmem:[%s4992_s7 + $0x4] ss:$28 sps:$4 sm:$0xff]  }
  0x31   :  { %v3388_v17 = vld [vmem:[%s4990_s5 + $0x12c] ss:$16 sps:$4 sm:$0xff]   ;;  %v3386_v18 = vld [vmem:[%s4990_s5 + $0x128] ss:$16 sps:$4 sm:$0xff]   ;;  %v4196_v39 = vshrl.u32 %v140_v38, 7  ;;  %vm2838_vm2 = vcmask 130048  }
  0x32   :  { %722 = vmatpush1.bf16.msra.mxu0 %v3395_v43  ;;  %v3394_v19 = vld [vmem:[%s4990_s5 + $0x14c] ss:$16 sps:$4 sm:$0xff]   ;;  %v3398_v22 = vld [vmem:[%s4990_s5 + $0x168] ss:$16 sps:$4 sm:$0xff]   ;;  %v138_v41 = vld [vmem:[%s4989_s4] sm:$0x3] }
  0x33   :  { %723 = vmatprep.subr.bf16.mxu0 %v3396_v44  ;;  %v3400_v21 = vld [vmem:[%s4990_s5 + $0x16c] ss:$16 sps:$4 sm:$0xff]   ;;  %v3404_v24 = vld [vmem:[%s4990_s5 + $0x188] ss:$16 sps:$4 sm:$0xff]   ;;  %v4199_v40 = vsub.s32 0, %v4196_v39  ;;  %v4205_v42 = vsub.s32 1, %v4196_v39 }
  0x34   :  { %v3406_v23 = vld [vmem:[%s4990_s5 + $0x18c] ss:$16 sps:$4 sm:$0xff]   ;;  %v3410_v26 = vld [vmem:[%s4990_s5 + $0x1a8] ss:$16 sps:$4 sm:$0xff]  }
  0x35   :  { %v3412_v25 = vld [vmem:[%s4990_s5 + $0x1ac] ss:$16 sps:$4 sm:$0xff]   ;;  %v3416_v30 = vld [vmem:[%s4990_s5 + $0x1c8] ss:$16 sps:$4 sm:$0xff]   ;;  %v143_v43 = vrot.slane %v138_v41, %v4199_v40  ;;  %v147_v44 = vrot.slane %v138_v41, %v4205_v42  ;;  %v3476_v41 = vld [vmem:[%s4992_s7 + $0x1c4] ss:$28 sps:$4 sm:$0xff]  }
  0x36   :  { %724 = vmatpush1.bf16.msra.mxu0 %v3401_v45  ;;  %v3418_v29 = vld [vmem:[%s4990_s5 + $0x1cc] ss:$16 sps:$4 sm:$0xff]   ;;  %v3422_v34 = vld [vmem:[%s4990_s5 + $0x1e8] ss:$16 sps:$4 sm:$0xff]  }
  0x37   :  { %725 = vmatprep.subr.bf16.mxu0 %v3402_v46  ;;  %v3424_v33 = vld [vmem:[%s4990_s5 + $0x1ec] ss:$16 sps:$4 sm:$0xff]  }
  0x38   :  { %v3431_v37 = vld [vmem:[%s4992_s7 + $0xc] ss:$28 sps:$4 sm:$0xff]  }
  0x39   :  { %v3471_v38 = vld [vmem:[%s4992_s7 + $0x190] ss:$28 sps:$4 sm:$0xff]  }
  0x3a   :  { %726 = vmatpush1.bf16.msra.mxu0 %v3407_v47 }
  0x3b   :  { %727 = vmatprep.subr.bf16.mxu0 %v3408_v48 }
  0x3e   :  { %728 = vmatpush1.bf16.msra.mxu0 %v3413_v27  ;;  %v3458_v27 = vld [vmem:[%s4992_s7 + $0x11c] ss:$28 sps:$4 sm:$0xff]  }
  0x3f   :  { %729 = vmatprep.subr.bf16.mxu0 %v3414_v28  ;;  %v3461_v28 = vld [vmem:[%s4992_s7 + $0x124] ss:$28 sps:$4 sm:$0xff]  }
  0x42   :  { %730 = vmatpush1.bf16.msra.mxu0 %v3419_v31  ;;  %v3464_v31 = vld [vmem:[%s4992_s7 + $0x154] ss:$28 sps:$4 sm:$0xff]  }
  0x43   :  { %731 = vmatprep.subr.bf16.mxu0 %v3420_v32  ;;  %v3467_v32 = vld [vmem:[%s4992_s7 + $0x15c] ss:$28 sps:$4 sm:$0xff]  }
  0x46   :  { %732 = vmatpush1.bf16.msra.mxu0 %v3425_v35  ;;  %v3470_v35 = vld [vmem:[%s4992_s7 + $0x18c] ss:$28 sps:$4 sm:$0xff]  }
  0x47   :  { %2276 = vmatprep.subr.bf16.mxu0 %v3428_v36  ;;  %v3473_v36 = vld [vmem:[%s4992_s7 + $0x194] ss:$28 sps:$4 sm:$0xff]  }
  0xd9   :  { %v3249_v50 = vpop.f32.mrb[0].mxu1 }
  0xda   :  { %v110_v51 = vadd.f32 %v3249_v50, %v2877_v49  ;;  %v101_v52 = vpop.f32.mrb[1].mxu1 }
  0xdb   :  { %v102_v53 = vadd.f32 %v2877_v49, %v101_v52  ;;  %v3250_v54 = vpop.f32.mrb[2].mxu1 }
  0xdc   :  { %v113_v55 = vadd.f32 %v3250_v54, %v2877_v49  ;;  %v104_v56 = vpop.f32.mrb[3].mxu1  ;;  %v118_v58 = vmax.f32 %v110_v51, 0.0 }
  0xdd   :  { %v105_v57 = vadd.f32 %v2877_v49, %v104_v56  ;;  %v116_v60 = vmax.f32 %v102_v53, 0.0 }
  0xde   :  { %v119_v59 = vmax.f32 %v113_v55, 0.0 }
  0xdf   :  { %v117_v61 = vmax.f32 %v105_v57, 0.0 }
  0xe0   :  { %v121_v62 = vpack.c.bf16 %v119_v59, %v118_v58 }
  0xe1   :  { %v120_v0 = vpack.c.bf16 %v117_v61, %v116_v60  ;;  %v3426_v60 = vld [vmem:[%s4992_s7] ss:$28 sps:$4 sm:$0xff]   ;;  %v3429_v61 = vld [vmem:[%s4992_s7 + $0x8] ss:$28 sps:$4 sm:$0xff]  }
  0xe3   :  { %263 = vmatmul.mubr.bf16.vlgmr.msra.gmra.mrb[4].mxu1 %v120_v0  ;;  %v3434_v0 = vld [vmem:[%s4992_s7 + $0x3c] ss:$28 sps:$4 sm:$0xff]  }
  0xe4   :  { %272 = vmatprep.mubr.bf16.mxu1 %v3882_v20  ;;  %755 = vmatpush1.bf16.msra.mxu1 %v3332_v63  ;;  %v3392_v20 = vld [vmem:[%s4990_s5 + $0x148] ss:$16 sps:$4 sm:$0xff]  }
  0xe5   :  { %756 = vmatprep.subr.bf16.mxu1 %v3340_v1  ;;  %v3437_v1 = vld [vmem:[%s4992_s7 + $0x44] ss:$28 sps:$4 sm:$0xff]  }
  0xe8   :  { %757 = vmatpush1.bf16.msra.mxu1 %v3338_v2 }
  0xe9   :  { %758 = vmatprep.subr.bf16.mxu1 %v3346_v3 }
  0xeb   :  { %273 = vmatmul.mubr.bf16.gmra.mrb[8].mxu1 %v121_v62 }
  0xec   :  { %759 = vmatpush1.bf16.msra.mxu1 %v3344_v4 }
  0xed   :  { %760 = vmatprep.subr.bf16.mxu1 %v3352_v5 }
  0xf0   :  { %761 = vmatpush1.bf16.msra.mxu1 %v3350_v6 }
  0xf1   :  { %762 = vmatprep.subr.bf16.mxu1 %v3358_v7  ;;  %v3432_v7 = vld [vmem:[%s4992_s7 + $0x38] ss:$28 sps:$4 sm:$0xff]  }
  0xf4   :  { %763 = vmatpush1.bf16.msra.mxu1 %v3356_v8  ;;  %v3435_v8 = vld [vmem:[%s4992_s7 + $0x40] ss:$28 sps:$4 sm:$0xff]  }
  0xf5   :  { %764 = vmatprep.subr.bf16.mxu1 %v3364_v9 }
  0xf8   :  { %765 = vmatpush1.bf16.msra.mxu1 %v3362_v10 }
  0xf9   :  { %766 = vmatprep.subr.bf16.mxu1 %v3370_v11  ;;  %v3440_v11 = vld [vmem:[%s4992_s7 + $0x74] ss:$28 sps:$4 sm:$0xff]  }
  0xfc   :  { %767 = vmatpush1.bf16.msra.mxu1 %v3368_v12  ;;  %v3443_v12 = vld [vmem:[%s4992_s7 + $0x7c] ss:$28 sps:$4 sm:$0xff]  }
  0xfd   :  { %768 = vmatprep.subr.bf16.mxu1 %v3376_v13 }
 0x100   :  { %769 = vmatpush1.bf16.msra.mxu1 %v3374_v14 }
 0x101   :  { %770 = vmatprep.subr.bf16.mxu1 %v3382_v15 }
 0x104   :  { %771 = vmatpush1.bf16.msra.mxu1 %v3380_v16 }
 0x105   :  { %772 = vmatprep.subr.bf16.mxu1 %v3388_v17  ;;  %v3438_v17 = vld [vmem:[%s4992_s7 + $0x70] ss:$28 sps:$4 sm:$0xff]  }
 0x108   :  { %773 = vmatpush1.bf16.msra.mxu1 %v3386_v18  ;;  %v3441_v18 = vld [vmem:[%s4992_s7 + $0x78] ss:$28 sps:$4 sm:$0xff]  }
 0x109   :  { %774 = vmatprep.subr.bf16.mxu1 %v3394_v19  ;;  %v3446_v19 = vld [vmem:[%s4992_s7 + $0xac] ss:$28 sps:$4 sm:$0xff]  }
 0x10c   :  { %775 = vmatpush1.bf16.msra.mxu1 %v3392_v20  ;;  %v3449_v20 = vld [vmem:[%s4992_s7 + $0xb4] ss:$28 sps:$4 sm:$0xff]  }
 0x10d   :  { %776 = vmatprep.subr.bf16.mxu1 %v3400_v21  ;;  %v3444_v21 = vld [vmem:[%s4992_s7 + $0xa8] ss:$28 sps:$4 sm:$0xff]  }
 0x110   :  { %777 = vmatpush1.bf16.msra.mxu1 %v3398_v22  ;;  %v3447_v22 = vld [vmem:[%s4992_s7 + $0xb0] ss:$28 sps:$4 sm:$0xff]  }
 0x111   :  { %778 = vmatprep.subr.bf16.mxu1 %v3406_v23  ;;  %v3452_v23 = vld [vmem:[%s4992_s7 + $0xe4] ss:$28 sps:$4 sm:$0xff]  }
 0x114   :  { %779 = vmatpush1.bf16.msra.mxu1 %v3404_v24  ;;  %v3455_v24 = vld [vmem:[%s4992_s7 + $0xec] ss:$28 sps:$4 sm:$0xff]  }
 0x115   :  { %780 = vmatprep.subr.bf16.mxu1 %v3412_v25  ;;  %v3450_v25 = vld [vmem:[%s4992_s7 + $0xe0] ss:$28 sps:$4 sm:$0xff]  }
 0x118   :  { %781 = vmatpush1.bf16.msra.mxu1 %v3410_v26  ;;  %v3453_v26 = vld [vmem:[%s4992_s7 + $0xe8] ss:$28 sps:$4 sm:$0xff]  }
 0x119   :  { %782 = vmatprep.subr.bf16.mxu1 %v3418_v29  ;;  %v3456_v29 = vld [vmem:[%s4992_s7 + $0x118] ss:$28 sps:$4 sm:$0xff]  }
 0x11c   :  { %783 = vmatpush1.bf16.msra.mxu1 %v3416_v30  ;;  %v3459_v30 = vld [vmem:[%s4992_s7 + $0x120] ss:$28 sps:$4 sm:$0xff]  }
 0x11d   :  { %784 = vmatprep.subr.bf16.mxu1 %v3424_v33  ;;  %v3462_v33 = vld [vmem:[%s4992_s7 + $0x150] ss:$28 sps:$4 sm:$0xff]  }
 0x120   :  { %785 = vmatpush1.bf16.msra.mxu1 %v3422_v34  ;;  %v3465_v34 = vld [vmem:[%s4992_s7 + $0x158] ss:$28 sps:$4 sm:$0xff]  }
 0x121   :  { %2382 = vmatprep.subr.bf16.mxu1 %v3431_v37  ;;  %v3468_v37 = vld [vmem:[%s4992_s7 + $0x188] ss:$28 sps:$4 sm:$0xff]  }
 0x1b6   :  { %v264_v45 = vpop.f32.mrb[4].mxu1 }
 0x1b7   :  { %v265_v46 = vadd.f32 %v264_v45, %v143_v43  ;;  %v266_v47 = vpop.f32.mrb[5].mxu1  ;;  %v3477_v45 = vld [vmem:[%s4992_s7 + $0x1c8] ss:$28 sps:$4 sm:$0xff]  }
 0x1b8   :  { %v267_v48 = vadd.f32 %v266_v47, %v147_v44  ;;  %v268_v49 = vpop.f32.mrb[6].mxu1  ;;  %v3485_v47 = vld [vmem:[%s4992_s7 + $0x204] ss:$28 sps:$4 sm:$0xff]  }
 0x1b9   :  { %v269_v50 = vadd.f32 %v268_v49, %v143_v43  ;;  %v270_v51 = vpop.f32.mrb[7].mxu1  ;;  %v283_v53 = vmax.f32 %v265_v46, 0.0  ;;  %v3482_v46 = vld [vmem:[%s4992_s7 + $0x1fc] ss:$28 sps:$4 sm:$0xff]  }
 0x1ba   :  { %v271_v52 = vadd.f32 %v270_v51, %v147_v44  ;;  %v284_v55 = vmax.f32 %v267_v48, 0.0  ;;  %v3480_v48 = vld [vmem:[%s4992_s7 + $0x1f8] ss:$28 sps:$4 sm:$0xff]   ;;  %v3483_v49 = vld [vmem:[%s4992_s7 + $0x200] ss:$28 sps:$4 sm:$0xff]  }
 0x1bb   :  { %v285_v54 = vmax.f32 %v269_v50, 0.0  ;;  %v3488_v50 = vld [vmem:[%s4992_s7 + $0x234] ss:$28 sps:$4 sm:$0xff]   ;;  %v3491_v51 = vld [vmem:[%s4992_s7 + $0x23c] ss:$28 sps:$4 sm:$0xff]  }
 0x1bc   :  { %v286_v56 = vmax.f32 %v271_v52, 0.0  ;;  %v3486_v52 = vld [vmem:[%s4992_s7 + $0x230] ss:$28 sps:$4 sm:$0xff]  }
 0x1bd   :  { %v291_v57 = vpack.c.bf16 %v285_v54, %v283_v53  ;;  %v3489_v53 = vld [vmem:[%s4992_s7 + $0x238] ss:$28 sps:$4 sm:$0xff]   ;;  %v3494_v54 = vld [vmem:[%s4992_s7 + $0x26c] ss:$28 sps:$4 sm:$0xff]  }
 0x1be   :  { %v274_v58 = vpop.f32.mrb[8].mxu1  ;;  %v292_v59 = vpack.c.bf16 %v286_v56, %v284_v55  ;;  %v3497_v55 = vld [vmem:[%s4992_s7 + $0x274] ss:$28 sps:$4 sm:$0xff]   ;;  %v3492_v56 = vld [vmem:[%s4992_s7 + $0x268] ss:$28 sps:$4 sm:$0xff]  }
 0x1bf   :  { %v275_v62 = vadd.f32 %v274_v58, %v143_v43  ;;  %v276_v63 = vpop.f32.mrb[9].mxu1  ;;  %v3500_v58 = vld [vmem:[%s4992_s7 + $0x2a4] ss:$28 sps:$4 sm:$0xff]  }
 0x1c0   :  { %v277_v2 = vadd.f32 %v276_v63, %v147_v44  ;;  %v278_v3 = vpop.f32.mrb[10].mxu1  ;;  %733 = vmatprep.mubr.bf16.mxu0 %v292_v59  ;;  %786 = vmatprep.mubr.bf16.mxu1 %v292_v59  ;;  %v3503_v59 = vld [vmem:[%s4992_s7 + $0x2ac] ss:$28 sps:$4 sm:$0xff]   ;;  %v3509_v63 = vld [vmem:[%s4992_s7 + $0x2e4] ss:$28 sps:$4 sm:$0xff]  }
 0x1c1   :  { %v279_v4 = vadd.f32 %v278_v3, %v143_v43  ;;  %v280_v5 = vpop.f32.mrb[11].mxu1  ;;  %734 = vmatmul.mubr.bf16.vlgmr.msra.gmra.mrb[0].mxu0 %v291_v57  ;;  %787 = vmatmul.mubr.bf16.vlgmr.msra.gmra.mrb[12].mxu1 %v291_v57  ;;  %v287_v9 = vmax.f32 %v275_v62, 0.0  ;;  %v3479_v43 = vld [vmem:[%s4992_s7 + $0x1cc] ss:$28 sps:$4 sm:$0xff]   ;;  %v3506_v62 = vld [vmem:[%s4992_s7 + $0x2dc] ss:$28 sps:$4 sm:$0xff]  }
 0x1c2   :  { %v281_v6 = vadd.f32 %v280_v5, %v147_v44  ;;  %2277 = vmatpush1.bf16.msra.mxu0 %v3426_v60  ;;  %2383 = vmatpush1.bf16.msra.mxu1 %v3429_v61  ;;  %v288_v13 = vmax.f32 %v277_v2, 0.0  ;;  %v3474_v44 = vld [vmem:[%s4992_s7 + $0x1c0] ss:$28 sps:$4 sm:$0xff]   ;;  %v3495_v57 = vld [vmem:[%s4992_s7 + $0x270] ss:$28 sps:$4 sm:$0xff]  }
 0x1c3   :  { %v289_v10 = vmax.f32 %v279_v4, 0.0  ;;  %2278 = vmatprep.subr.bf16.mxu0 %v3434_v0  ;;  %2384 = vmatprep.subr.bf16.mxu1 %v3437_v1  ;;  %v3498_v60 = vld [vmem:[%s4992_s7 + $0x2a0] ss:$28 sps:$4 sm:$0xff]   ;;  %v3501_v61 = vld [vmem:[%s4992_s7 + $0x2a8] ss:$28 sps:$4 sm:$0xff]  }
 0x1c4   :  { %v290_v14 = vmax.f32 %v281_v6, 0.0  ;;  %v3504_v0 = vld [vmem:[%s4992_s7 + $0x2d8] ss:$28 sps:$4 sm:$0xff]   ;;  %v3507_v1 = vld [vmem:[%s4992_s7 + $0x2e0] ss:$28 sps:$4 sm:$0xff]  }
 0x1c5   :  { %v293_v15 = vpack.c.bf16 %v289_v10, %v287_v9  ;;  %v3512_v2 = vld [vmem:[%s4992_s7 + $0x314] ss:$28 sps:$4 sm:$0xff]   ;;  %v3515_v3 = vld [vmem:[%s4992_s7 + $0x31c] ss:$28 sps:$4 sm:$0xff]   ;;  %v3518_v6 = vld [vmem:[%s4992_s7 + $0x34c] ss:$28 sps:$4 sm:$0xff]  }
 0x1c6   :  { %v294_v16 = vpack.c.bf16 %v290_v14, %v288_v13  ;;  %2279 = vmatpush1.bf16.msra.mxu0 %v3432_v7  ;;  %2385 = vmatpush1.bf16.msra.mxu1 %v3435_v8  ;;  %v3510_v4 = vld [vmem:[%s4992_s7 + $0x310] ss:$28 sps:$4 sm:$0xff]   ;;  %v3513_v5 = vld [vmem:[%s4992_s7 + $0x318] ss:$28 sps:$4 sm:$0xff]   ;;  %v3516_v8 = vld [vmem:[%s4992_s7 + $0x348] ss:$28 sps:$4 sm:$0xff]  }
 0x1c7   :  { %2280 = vmatprep.subr.bf16.mxu0 %v3440_v11  ;;  %2386 = vmatprep.subr.bf16.mxu1 %v3443_v12  ;;  %v3521_v7 = vld [vmem:[%s4992_s7 + $0x354] ss:$28 sps:$4 sm:$0xff]   ;;  %v3524_v10 = vld [vmem:[%s4992_s7 + $0x384] ss:$28 sps:$4 sm:$0xff]   ;;  %v3527_v11 = vld [vmem:[%s4992_s7 + $0x38c] ss:$28 sps:$4 sm:$0xff]  }
 0x1c8   :  { %743 = vmatprep.mubr.bf16.mxu0 %v294_v16  ;;  %796 = vmatprep.mubr.bf16.mxu1 %v294_v16  ;;  %v3519_v9 = vld [vmem:[%s4992_s7 + $0x350] ss:$28 sps:$4 sm:$0xff]   ;;  %v371_v12 = vsub.s32 2, %v4196_v39  ;;  %v359_v13 = vld [vmem:[%s4991_s6] sm:$0xf]  ;;  %v375_v14 = vsub.s32 3, %v4196_v39 }
 0x1c9   :  { %744 = vmatmul.mubr.bf16.gmra.mrb[4].mxu0 %v293_v15  ;;  %797 = vmatmul.mubr.bf16.gmra.mrb[16].mxu1 %v293_v15  ;;  %v364_v15 = vrot.slane %v359_v13, %v4199_v40 }
 0x1ca   :  { %2281 = vmatpush1.bf16.msra.mxu0 %v3438_v17  ;;  %2387 = vmatpush1.bf16.msra.mxu1 %v3441_v18  ;;  %v372_v16 = vrot.slane %v359_v13, %v371_v12  ;;  %v368_v17 = vrot.slane %v359_v13, %v4205_v42  ;;  %v376_v18 = vrot.slane %v359_v13, %v375_v14 }
 0x1cb   :  { %2282 = vmatprep.subr.bf16.mxu0 %v3446_v19  ;;  %2388 = vmatprep.subr.bf16.mxu1 %v3449_v20 }
 0x1ce   :  { %2283 = vmatpush1.bf16.msra.mxu0 %v3444_v21  ;;  %2389 = vmatpush1.bf16.msra.mxu1 %v3447_v22 }
 0x1cf   :  { %2284 = vmatprep.subr.bf16.mxu0 %v3452_v23  ;;  %2390 = vmatprep.subr.bf16.mxu1 %v3455_v24 }
 0x1d2   :  { %2285 = vmatpush1.bf16.msra.mxu0 %v3450_v25  ;;  %2391 = vmatpush1.bf16.msra.mxu1 %v3453_v26 }
 0x1d3   :  { %2286 = vmatprep.subr.bf16.mxu0 %v3458_v27  ;;  %2392 = vmatprep.subr.bf16.mxu1 %v3461_v28 }
 0x1d6   :  { %2287 = vmatpush1.bf16.msra.mxu0 %v3456_v29  ;;  %2393 = vmatpush1.bf16.msra.mxu1 %v3459_v30 }
 0x1d7   :  { %2288 = vmatprep.subr.bf16.mxu0 %v3464_v31  ;;  %2394 = vmatprep.subr.bf16.mxu1 %v3467_v32 }
 0x1da   :  { %2289 = vmatpush1.bf16.msra.mxu0 %v3462_v33  ;;  %2395 = vmatpush1.bf16.msra.mxu1 %v3465_v34 }
 0x1db   :  { %2290 = vmatprep.subr.bf16.mxu0 %v3470_v35  ;;  %2396 = vmatprep.subr.bf16.mxu1 %v3473_v36 }
 0x1de   :  { %2291 = vmatpush1.bf16.msra.mxu0 %v3468_v37  ;;  %2397 = vmatpush1.bf16.msra.mxu1 %v3471_v38 }
 0x1df   :  { %2292 = vmatprep.subr.bf16.mxu0 %v3476_v41  ;;  %2398 = vmatprep.subr.bf16.mxu1 %v3479_v43 }
 0x1e2   :  { %2293 = vmatpush1.bf16.msra.mxu0 %v3474_v44  ;;  %2399 = vmatpush1.bf16.msra.mxu1 %v3477_v45 }
 0x1e3   :  { %2294 = vmatprep.subr.bf16.mxu0 %v3482_v46  ;;  %2400 = vmatprep.subr.bf16.mxu1 %v3485_v47 }
 0x1e6   :  { %2295 = vmatpush1.bf16.msra.mxu0 %v3480_v48  ;;  %2401 = vmatpush1.bf16.msra.mxu1 %v3483_v49 }
 0x1e7   :  { %2296 = vmatprep.subr.bf16.mxu0 %v3488_v50  ;;  %2402 = vmatprep.subr.bf16.mxu1 %v3491_v51 }
 0x1ea   :  { %2297 = vmatpush1.bf16.msra.mxu0 %v3486_v52  ;;  %2403 = vmatpush1.bf16.msra.mxu1 %v3489_v53  ;;  %v3522_v52 = vld [vmem:[%s4992_s7 + $0x380] ss:$28 sps:$4 sm:$0xff]   ;;  %v3525_v53 = vld [vmem:[%s4992_s7 + $0x388] ss:$28 sps:$4 sm:$0xff]  }
 0x1eb   :  { %2298 = vmatprep.subr.bf16.mxu0 %v3494_v54  ;;  %2404 = vmatprep.subr.bf16.mxu1 %v3497_v55 }
 0x1ee   :  { %2299 = vmatpush1.bf16.msra.mxu0 %v3492_v56  ;;  %2405 = vmatpush1.bf16.msra.mxu1 %v3495_v57 }
 0x1ef   :  { %2300 = vmatprep.subr.bf16.mxu0 %v3500_v58  ;;  %2406 = vmatprep.subr.bf16.mxu1 %v3503_v59  ;;  %v3530_v58 = vld [vmem:[%s4992_s7 + $0x3bc] ss:$28 sps:$4 sm:$0xff]   ;;  %v3533_v59 = vld [vmem:[%s4992_s7 + $0x3c4] ss:$28 sps:$4 sm:$0xff]  }
 0x1f2   :  { %2301 = vmatpush1.bf16.msra.mxu0 %v3498_v60  ;;  %2407 = vmatpush1.bf16.msra.mxu1 %v3501_v61 }
 0x1f3   :  { %2302 = vmatprep.subr.bf16.mxu0 %v3506_v62  ;;  %2408 = vmatprep.subr.bf16.mxu1 %v3509_v63 }
 0x1f6   :  { %2303 = vmatpush1.bf16.msra.mxu0 %v3504_v0  ;;  %2409 = vmatpush1.bf16.msra.mxu1 %v3507_v1 }
 0x1f7   :  { %2304 = vmatprep.subr.bf16.mxu0 %v3512_v2  ;;  %2410 = vmatprep.subr.bf16.mxu1 %v3515_v3 }
 0x1fa   :  { %2305 = vmatpush1.bf16.msra.mxu0 %v3510_v4  ;;  %2411 = vmatpush1.bf16.msra.mxu1 %v3513_v5 }
 0x1fb   :  { %2306 = vmatprep.subr.bf16.mxu0 %v3518_v6  ;;  %2412 = vmatprep.subr.bf16.mxu1 %v3521_v7  ;;  %v3528_v6 = vld [vmem:[%s4992_s7 + $0x3b8] ss:$28 sps:$4 sm:$0xff]   ;;  %v3531_v7 = vld [vmem:[%s4992_s7 + $0x3c0] ss:$28 sps:$4 sm:$0xff]  }
 0x1fe   :  { %2307 = vmatpush1.bf16.msra.mxu0 %v3516_v8  ;;  %2413 = vmatpush1.bf16.msra.mxu1 %v3519_v9  ;;  %v3536_v8 = vld [vmem:[%s4992_s7 + $0x3f4] ss:$28 sps:$4 sm:$0xff]  }
 0x1ff   :  { %2329 = vmatprep.subr.bf16.mxu0 %v3524_v10  ;;  %2435 = vmatprep.subr.bf16.mxu1 %v3527_v11 }
 0x294   :  { %v735_v19 = vpop.f32.mrb[0].mxu0  ;;  %v788_v20 = vpop.f32.mrb[12].mxu1 }
 0x295   :  { %v736_v21 = vadd.f32 %v735_v19, %v364_v15  ;;  %v789_v22 = vadd.f32 %v788_v20, %v372_v16  ;;  %v737_v23 = vpop.f32.mrb[1].mxu0  ;;  %v790_v24 = vpop.f32.mrb[13].mxu1 }
 0x296   :  { %v738_v25 = vadd.f32 %v737_v23, %v368_v17  ;;  %v791_v26 = vadd.f32 %v790_v24, %v376_v18  ;;  %v739_v27 = vpop.f32.mrb[2].mxu0  ;;  %v792_v28 = vpop.f32.mrb[14].mxu1  ;;  %v3534_v24 = vld [vmem:[%s4992_s7 + $0x3f0] ss:$28 sps:$4 sm:$0xff]  }
 0x297   :  { %v740_v29 = vadd.f32 %v739_v27, %v364_v15  ;;  %v793_v30 = vadd.f32 %v792_v28, %v372_v16  ;;  %v741_v31 = vpop.f32.mrb[3].mxu0  ;;  %v794_v32 = vpop.f32.mrb[15].mxu1  ;;  %v807_v35 = vmax.f32 %v736_v21, 0.0  ;;  %v809_v36 = vmax.f32 %v789_v22, 0.0  ;;  %v3545_v27 = vld [vmem:[%s4992_s7 + $0x434] ss:$28 sps:$4 sm:$0xff]  }
 0x298   :  { %v742_v33 = vadd.f32 %v741_v31, %v368_v17  ;;  %v795_v34 = vadd.f32 %v794_v32, %v376_v18  ;;  %v808_v41 = vmax.f32 %v738_v25, 0.0  ;;  %v810_v43 = vmax.f32 %v791_v26, 0.0  ;;  %v3537_v25 = vld [vmem:[%s4992_s7 + $0x3f8] ss:$28 sps:$4 sm:$0xff]   ;;  %v3542_v26 = vld [vmem:[%s4992_s7 + $0x42c] ss:$28 sps:$4 sm:$0xff]  }
 0x299   :  { %v811_v37 = vmax.f32 %v740_v29, 0.0  ;;  %v813_v38 = vmax.f32 %v793_v30, 0.0  ;;  %v3540_v28 = vld [vmem:[%s4992_s7 + $0x428] ss:$28 sps:$4 sm:$0xff]   ;;  %v3543_v29 = vld [vmem:[%s4992_s7 + $0x430] ss:$28 sps:$4 sm:$0xff]  }
 0x29a   :  { %v812_v44 = vmax.f32 %v742_v33, 0.0  ;;  %v814_v45 = vmax.f32 %v795_v34, 0.0  ;;  %v3548_v30 = vld [vmem:[%s4992_s7 + $0x464] ss:$28 sps:$4 sm:$0xff]   ;;  %v3551_v31 = vld [vmem:[%s4992_s7 + $0x46c] ss:$28 sps:$4 sm:$0xff]  }
 0x29b   :  { %v4412_v46 = vpack.c.bf16 %v811_v37, %v807_v35  ;;  %v4414_v47 = vpack.c.bf16 %v813_v38, %v809_v36  ;;  %v3546_v32 = vld [vmem:[%s4992_s7 + $0x460] ss:$28 sps:$4 sm:$0xff]   ;;  %v3549_v33 = vld [vmem:[%s4992_s7 + $0x468] ss:$28 sps:$4 sm:$0xff]   ;;  %v3552_v36 = vld [vmem:[%s4992_s7 + $0x498] ss:$28 sps:$4 sm:$0xff]  }
 0x29c   :  { %v4416_v48 = vpack.c.bf16 %v812_v44, %v808_v41  ;;  %v4418_v49 = vpack.c.bf16 %v814_v45, %v810_v43  ;;  %v745_v50 = vpop.f32.mrb[4].mxu0  ;;  %v798_v51 = vpop.f32.mrb[16].mxu1  ;;  %v3554_v34 = vld [vmem:[%s4992_s7 + $0x49c] ss:$28 sps:$4 sm:$0xff]   ;;  %v3557_v35 = vld [vmem:[%s4992_s7 + $0x4a4] ss:$28 sps:$4 sm:$0xff]  }
 0x29d   :  { %v746_v54 = vadd.f32 %v745_v50, %v364_v15  ;;  %v799_v55 = vadd.f32 %v798_v51, %v372_v16  ;;  %v747_v56 = vpop.f32.mrb[5].mxu0  ;;  %v800_v57 = vpop.f32.mrb[17].mxu1  ;;  %v3555_v37 = vld [vmem:[%s4992_s7 + $0x4a0] ss:$28 sps:$4 sm:$0xff]   ;;  %v3560_v38 = vld [vmem:[%s4992_s7 + $0x4d4] ss:$28 sps:$4 sm:$0xff]  }
 0x29e   :  { %v748_v60 = vadd.f32 %v747_v56, %v368_v17  ;;  %v801_v61 = vadd.f32 %v800_v57, %v376_v18  ;;  %v749_v62 = vpop.f32.mrb[6].mxu0  ;;  %v802_v63 = vpop.f32.mrb[18].mxu1  ;;  %2308 = vmatprep.mubr.bf16.mxu0 %v4416_v48  ;;  %2414 = vmatprep.mubr.bf16.mxu1 %v4416_v48  ;;  %v3563_v41 = vld [vmem:[%s4992_s7 + $0x4dc] ss:$28 sps:$4 sm:$0xff]   ;;  %v3558_v43 = vld [vmem:[%s4992_s7 + $0x4d0] ss:$28 sps:$4 sm:$0xff]  }
 0x29f   :  { %v750_v0 = vadd.f32 %v749_v62, %v364_v15  ;;  %v803_v1 = vadd.f32 %v802_v63, %v372_v16  ;;  %v751_v2 = vpop.f32.mrb[7].mxu0  ;;  %v804_v3 = vpop.f32.mrb[19].mxu1  ;;  %2309 = vmatmul.mubr.bf16.vlgmr.msra.gmra.mrb[8].mxu0 %v4412_v46  ;;  %2415 = vmatmul.mubr.bf16.vlgmr.msra.gmra.mrb[20].mxu1 %v4412_v46  ;;  %v815_v9 = vmax.f32 %v746_v54, 0.0  ;;  %v817_v10 = vmax.f32 %v799_v55, 0.0  ;;  %v3539_v15 = vld [vmem:[%s4992_s7 + $0x3fc] ss:$28 sps:$4 sm:$0xff]  }
 0x2a0   :  { %v752_v4 = vadd.f32 %v751_v2, %v368_v17  ;;  %v805_v5 = vadd.f32 %v804_v3, %v376_v18  ;;  %2330 = vmatpush1.bf16.msra.mxu0 %v3522_v52  ;;  %2436 = vmatpush1.bf16.msra.mxu1 %v3525_v53  ;;  %v816_v16 = vmax.f32 %v748_v60, 0.0  ;;  %v818_v17 = vmax.f32 %v801_v61, 0.0  ;;  %v3561_v44 = vld [vmem:[%s4992_s7 + $0x4d8] ss:$28 sps:$4 sm:$0xff]   ;;  %v3566_v45 = vld [vmem:[%s4992_s7 + $0x50c] ss:$28 sps:$4 sm:$0xff]  }
 0x2a1   :  { %v819_v11 = vmax.f32 %v750_v0, 0.0  ;;  %v821_v13 = vmax.f32 %v803_v1, 0.0  ;;  %2331 = vmatprep.subr.bf16.mxu0 %v3530_v58  ;;  %2437 = vmatprep.subr.bf16.mxu1 %v3533_v59  ;;  %v3569_v50 = vld [vmem:[%s4992_s7 + $0x514] ss:$28 sps:$4 sm:$0xff]   ;;  %v3564_v51 = vld [vmem:[%s4992_s7 + $0x508] ss:$28 sps:$4 sm:$0xff]  }
 0x2a2   :  { %v820_v18 = vmax.f32 %v752_v4, 0.0  ;;  %v822_v19 = vmax.f32 %v805_v5, 0.0  ;;  %v3567_v52 = vld [vmem:[%s4992_s7 + $0x510] ss:$28 sps:$4 sm:$0xff]   ;;  %v3572_v53 = vld [vmem:[%s4992_s7 + $0x544] ss:$28 sps:$4 sm:$0xff]  }
 0x2a3   :  { %v4448_v20 = vpack.c.bf16 %v819_v11, %v815_v9  ;;  %v4450_v21 = vpack.c.bf16 %v821_v13, %v817_v10  ;;  %v3575_v54 = vld [vmem:[%s4992_s7 + $0x54c] ss:$28 sps:$4 sm:$0xff]   ;;  %v3570_v55 = vld [vmem:[%s4992_s7 + $0x540] ss:$28 sps:$4 sm:$0xff]   ;;  %v3576_v59 = vld [vmem:[%s4992_s7 + $0x578] ss:$28 sps:$4 sm:$0xff]  }
 0x2a4   :  { %v4452_v22 = vpack.c.bf16 %v820_v18, %v816_v16  ;;  %v4454_v23 = vpack.c.bf16 %v822_v19, %v818_v17  ;;  %2332 = vmatpush1.bf16.msra.mxu0 %v3528_v6  ;;  %2438 = vmatpush1.bf16.msra.mxu1 %v3531_v7  ;;  %v3573_v56 = vld [vmem:[%s4992_s7 + $0x548] ss:$28 sps:$4 sm:$0xff]   ;;  %v3578_v57 = vld [vmem:[%s4992_s7 + $0x57c] ss:$28 sps:$4 sm:$0xff]   ;;  %v3584_v61 = vld [vmem:[%s4992_s7 + $0x5b4] ss:$28 sps:$4 sm:$0xff]  }
 0x2a5   :  { %2333 = vmatprep.subr.bf16.mxu0 %v3536_v8  ;;  %2439 = vmatprep.subr.bf16.mxu1 %v3539_v15  ;;  %v3581_v58 = vld [vmem:[%s4992_s7 + $0x584] ss:$28 sps:$4 sm:$0xff]   ;;  %v3587_v62 = vld [vmem:[%s4992_s7 + $0x5bc] ss:$28 sps:$4 sm:$0xff]   ;;  %v3582_v63 = vld [vmem:[%s4992_s7 + $0x5b0] ss:$28 sps:$4 sm:$0xff]  }
 0x2a6   :  { %2318 = vmatprep.mubr.bf16.mxu0 %v4452_v22  ;;  %2424 = vmatprep.mubr.bf16.mxu1 %v4452_v22  ;;  %v3579_v60 = vld [vmem:[%s4992_s7 + $0x580] ss:$28 sps:$4 sm:$0xff]   ;;  %v3585_v0 = vld [vmem:[%s4992_s7 + $0x5b8] ss:$28 sps:$4 sm:$0xff]   ;;  %v3590_v1 = vld [vmem:[%s4992_s7 + $0x5ec] ss:$28 sps:$4 sm:$0xff]  }
 0x2a7   :  { %2319 = vmatmul.mubr.bf16.gmra.mrb[12].mxu0 %v4448_v20  ;;  %2425 = vmatmul.mubr.bf16.gmra.mrb[24].mxu1 %v4448_v20  ;;  %v3593_v2 = vld [vmem:[%s4992_s7 + $0x5f4] ss:$28 sps:$4 sm:$0xff]   ;;  %v3588_v3 = vld [vmem:[%s4992_s7 + $0x5e8] ss:$28 sps:$4 sm:$0xff]   ;;  %v3594_v7 = vld [vmem:[%s4992_s7 + $0x620] ss:$28 sps:$4 sm:$0xff]  }
 0x2a8   :  { %2334 = vmatpush1.bf16.msra.mxu0 %v3534_v24  ;;  %2440 = vmatpush1.bf16.msra.mxu1 %v3537_v25  ;;  %v3591_v4 = vld [vmem:[%s4992_s7 + $0x5f0] ss:$28 sps:$4 sm:$0xff]   ;;  %v3596_v5 = vld [vmem:[%s4992_s7 + $0x624] ss:$28 sps:$4 sm:$0xff]   ;;  %v3602_v9 = vld [vmem:[%s4992_s7 + $0x65c] ss:$28 sps:$4 sm:$0xff]  }
 0x2a9   :  { %2361 = vmatprep.mubr.bf16.mxu0 %v4418_v49  ;;  %2467 = vmatprep.mubr.bf16.mxu1 %v4418_v49  ;;  %v3599_v6 = vld [vmem:[%s4992_s7 + $0x62c] ss:$28 sps:$4 sm:$0xff]   ;;  %v3605_v10 = vld [vmem:[%s4992_s7 + $0x664] ss:$28 sps:$4 sm:$0xff]   ;;  %v3600_v11 = vld [vmem:[%s4992_s7 + $0x658] ss:$28 sps:$4 sm:$0xff]  }
 0x2aa   :  { %2335 = vmatprep.subr.bf16.mxu0 %v3542_v26  ;;  %2441 = vmatprep.subr.bf16.mxu1 %v3545_v27  ;;  %v3597_v8 = vld [vmem:[%s4992_s7 + $0x628] ss:$28 sps:$4 sm:$0xff]   ;;  %v3603_v13 = vld [vmem:[%s4992_s7 + $0x660] ss:$28 sps:$4 sm:$0xff]   ;;  %v3608_v15 = vld [vmem:[%s4992_s7 + $0x694] ss:$28 sps:$4 sm:$0xff]  }
 0x2ab   :  { %v3611_v16 = vld [vmem:[%s4992_s7 + $0x69c] ss:$28 sps:$4 sm:$0xff]   ;;  %v3606_v17 = vld [vmem:[%s4992_s7 + $0x690] ss:$28 sps:$4 sm:$0xff]   ;;  %v3612_v25 = vld [vmem:[%s4992_s7 + $0x6c8] ss:$28 sps:$4 sm:$0xff]  }
 0x2ac   :  { %2336 = vmatpush1.bf16.msra.mxu0 %v3540_v28  ;;  %2442 = vmatpush1.bf16.msra.mxu1 %v3543_v29  ;;  %v3609_v18 = vld [vmem:[%s4992_s7 + $0x698] ss:$28 sps:$4 sm:$0xff]   ;;  %v3614_v19 = vld [vmem:[%s4992_s7 + $0x6cc] ss:$28 sps:$4 sm:$0xff]  }
 0x2ad   :  { %2337 = vmatprep.subr.bf16.mxu0 %v3548_v30  ;;  %2443 = vmatprep.subr.bf16.mxu1 %v3551_v31  ;;  %v3617_v24 = vld [vmem:[%s4992_s7 + $0x6d4] ss:$28 sps:$4 sm:$0xff]   ;;  %v3625_v31 = vld [vmem:[%s4992_s7 + $0x4c] ss:$28 sps:$4 sm:$0xff]  }
 0x2ae   :  { %v3615_v26 = vld [vmem:[%s4992_s7 + $0x6d0] ss:$28 sps:$4 sm:$0xff]   ;;  %v3621_v28 = vld [vmem:[%s4992_s7 + $0x1d8] ss:$28 sps:$4 sm:$0xff]  }
 0x2af   :  { %v3620_v27 = vld [vmem:[%s4992_s7 + $0x14] ss:$28 sps:$4 sm:$0xff]  }
 0x2b0   :  { %2338 = vmatpush1.bf16.msra.mxu0 %v3546_v32  ;;  %2444 = vmatpush1.bf16.msra.mxu1 %v3549_v33  ;;  %v3618_v29 = vld [vmem:[%s4992_s7 + $0x10] ss:$28 sps:$4 sm:$0xff]   ;;  %v3622_v30 = vld [vmem:[%s4992_s7 + $0x18] ss:$28 sps:$4 sm:$0xff]   ;;  %v3623_v33 = vld [vmem:[%s4992_s7 + $0x48] ss:$28 sps:$4 sm:$0xff]  }
 0x2b1   :  { %2339 = vmatprep.subr.bf16.mxu0 %v3554_v34  ;;  %2445 = vmatprep.subr.bf16.mxu1 %v3557_v35  ;;  %v3626_v32 = vld [vmem:[%s4992_s7 + $0x210] ss:$28 sps:$4 sm:$0xff]   ;;  %v3630_v35 = vld [vmem:[%s4992_s7 + $0x84] ss:$28 sps:$4 sm:$0xff]  }
 0x2b2   :  { %v3627_v34 = vld [vmem:[%s4992_s7 + $0x50] ss:$28 sps:$4 sm:$0xff]  }
 0x2b4   :  { %2340 = vmatpush1.bf16.msra.mxu0 %v3552_v36  ;;  %2446 = vmatpush1.bf16.msra.mxu1 %v3555_v37  ;;  %v3631_v36 = vld [vmem:[%s4992_s7 + $0x248] ss:$28 sps:$4 sm:$0xff]   ;;  %v3628_v37 = vld [vmem:[%s4992_s7 + $0x80] ss:$28 sps:$4 sm:$0xff]  }
 0x2b5   :  { %2341 = vmatprep.subr.bf16.mxu0 %v3560_v38  ;;  %2447 = vmatprep.subr.bf16.mxu1 %v3563_v41  ;;  %v3632_v38 = vld [vmem:[%s4992_s7 + $0x88] ss:$28 sps:$4 sm:$0xff]   ;;  %v3635_v41 = vld [vmem:[%s4992_s7 + $0xbc] ss:$28 sps:$4 sm:$0xff]  }
 0x2b8   :  { %2342 = vmatpush1.bf16.msra.mxu0 %v3558_v43  ;;  %2448 = vmatpush1.bf16.msra.mxu1 %v3561_v44  ;;  %v3636_v43 = vld [vmem:[%s4992_s7 + $0x280] ss:$28 sps:$4 sm:$0xff]   ;;  %v3633_v44 = vld [vmem:[%s4992_s7 + $0xb8] ss:$28 sps:$4 sm:$0xff]  }
 0x2b9   :  { %2343 = vmatprep.subr.bf16.mxu0 %v3566_v45  ;;  %2449 = vmatprep.subr.bf16.mxu1 %v3569_v50  ;;  %v3637_v45 = vld [vmem:[%s4992_s7 + $0xc0] ss:$28 sps:$4 sm:$0xff]   ;;  %v3640_v50 = vld [vmem:[%s4992_s7 + $0xf4] ss:$28 sps:$4 sm:$0xff]  }
 0x2bc   :  { %2344 = vmatpush1.bf16.msra.mxu0 %v3564_v51  ;;  %2450 = vmatpush1.bf16.msra.mxu1 %v3567_v52  ;;  %v3638_v51 = vld [vmem:[%s4992_s7 + $0xf0] ss:$28 sps:$4 sm:$0xff]   ;;  %v3642_v52 = vld [vmem:[%s4992_s7 + $0xf8] ss:$28 sps:$4 sm:$0xff]  }
 0x2bd   :  { %2345 = vmatprep.subr.bf16.mxu0 %v3572_v53  ;;  %2451 = vmatprep.subr.bf16.mxu1 %v3575_v54  ;;  %v3645_v53 = vld [vmem:[%s4992_s7 + $0x12c] ss:$28 sps:$4 sm:$0xff]  }
 0x2be   :  { %v3646_v54 = vld [vmem:[%s4992_s7 + $0x2f0] ss:$28 sps:$4 sm:$0xff]  }
 0x2c0   :  { %2346 = vmatpush1.bf16.msra.mxu0 %v3570_v55  ;;  %2452 = vmatpush1.bf16.msra.mxu1 %v3573_v56  ;;  %v3643_v55 = vld [vmem:[%s4992_s7 + $0x128] ss:$28 sps:$4 sm:$0xff]   ;;  %v3647_v56 = vld [vmem:[%s4992_s7 + $0x130] ss:$28 sps:$4 sm:$0xff]  }
 0x2c1   :  { %2347 = vmatprep.subr.bf16.mxu0 %v3578_v57  ;;  %2453 = vmatprep.subr.bf16.mxu1 %v3581_v58  ;;  %v3650_v57 = vld [vmem:[%s4992_s7 + $0x164] ss:$28 sps:$4 sm:$0xff]  }
 0x2c2   :  { %v3651_v58 = vld [vmem:[%s4992_s7 + $0x328] ss:$28 sps:$4 sm:$0xff]  }
 0x2c4   :  { %2348 = vmatpush1.bf16.msra.mxu0 %v3576_v59  ;;  %2454 = vmatpush1.bf16.msra.mxu1 %v3579_v60  ;;  %v3648_v59 = vld [vmem:[%s4992_s7 + $0x160] ss:$28 sps:$4 sm:$0xff]   ;;  %v3652_v60 = vld [vmem:[%s4992_s7 + $0x168] ss:$28 sps:$4 sm:$0xff]  }
 0x2c5   :  { %2349 = vmatprep.subr.bf16.mxu0 %v3584_v61  ;;  %2455 = vmatprep.subr.bf16.mxu1 %v3587_v62  ;;  %v3655_v61 = vld [vmem:[%s4992_s7 + $0x19c] ss:$28 sps:$4 sm:$0xff]  }
 0x2c6   :  { %v3656_v62 = vld [vmem:[%s4992_s7 + $0x360] ss:$28 sps:$4 sm:$0xff]  }
 0x2c8   :  { %2350 = vmatpush1.bf16.msra.mxu0 %v3582_v63  ;;  %2456 = vmatpush1.bf16.msra.mxu1 %v3585_v0  ;;  %v3653_v63 = vld [vmem:[%s4992_s7 + $0x198] ss:$28 sps:$4 sm:$0xff]   ;;  %v3657_v0 = vld [vmem:[%s4992_s7 + $0x1a0] ss:$28 sps:$4 sm:$0xff]  }
 0x2c9   :  { %2351 = vmatprep.subr.bf16.mxu0 %v3590_v1  ;;  %2457 = vmatprep.subr.bf16.mxu1 %v3593_v2  ;;  %v3660_v1 = vld [vmem:[%s4992_s7 + $0x1d4] ss:$28 sps:$4 sm:$0xff]  }
 0x2ca   :  { %v3661_v2 = vld [vmem:[%s4992_s7 + $0x558] ss:$28 sps:$4 sm:$0xff]  }
 0x2cc   :  { %2352 = vmatpush1.bf16.msra.mxu0 %v3588_v3  ;;  %2458 = vmatpush1.bf16.msra.mxu1 %v3591_v4  ;;  %v3658_v3 = vld [vmem:[%s4992_s7 + $0x1d0] ss:$28 sps:$4 sm:$0xff]   ;;  %v3662_v4 = vld [vmem:[%s4992_s7 + $0x398] ss:$28 sps:$4 sm:$0xff]  }
 0x2cd   :  { %2353 = vmatprep.subr.bf16.mxu0 %v3596_v5  ;;  %2459 = vmatprep.subr.bf16.mxu1 %v3599_v6  ;;  %v3665_v5 = vld [vmem:[%s4992_s7 + $0x20c] ss:$28 sps:$4 sm:$0xff]  }
 0x2ce   :  { %v3666_v6 = vld [vmem:[%s4992_s7 + $0x590] ss:$28 sps:$4 sm:$0xff]  }
 0x2d0   :  { %2354 = vmatpush1.bf16.msra.mxu0 %v3594_v7  ;;  %2460 = vmatpush1.bf16.msra.mxu1 %v3597_v8  ;;  %v3663_v7 = vld [vmem:[%s4992_s7 + $0x208] ss:$28 sps:$4 sm:$0xff]   ;;  %v3667_v8 = vld [vmem:[%s4992_s7 + $0x3d0] ss:$28 sps:$4 sm:$0xff]  }
 0x2d1   :  { %2355 = vmatprep.subr.bf16.mxu0 %v3602_v9  ;;  %2461 = vmatprep.subr.bf16.mxu1 %v3605_v10  ;;  %v3670_v9 = vld [vmem:[%s4992_s7 + $0x244] ss:$28 sps:$4 sm:$0xff]  }
 0x2d2   :  { %v3671_v10 = vld [vmem:[%s4992_s7 + $0x5c8] ss:$28 sps:$4 sm:$0xff]  }
 0x2d4   :  { %2356 = vmatpush1.bf16.msra.mxu0 %v3600_v11  ;;  %2462 = vmatpush1.bf16.msra.mxu1 %v3603_v13  ;;  %v3668_v11 = vld [vmem:[%s4992_s7 + $0x240] ss:$28 sps:$4 sm:$0xff]   ;;  %v3672_v13 = vld [vmem:[%s4992_s7 + $0x408] ss:$28 sps:$4 sm:$0xff]  }
 0x2d5   :  { %2357 = vmatprep.subr.bf16.mxu0 %v3608_v15  ;;  %2463 = vmatprep.subr.bf16.mxu1 %v3611_v16  ;;  %v3675_v15 = vld [vmem:[%s4992_s7 + $0x27c] ss:$28 sps:$4 sm:$0xff]  }
 0x2d6   :  { %v3676_v16 = vld [vmem:[%s4992_s7 + $0x600] ss:$28 sps:$4 sm:$0xff]  }
 0x2d8   :  { %2358 = vmatpush1.bf16.msra.mxu0 %v3606_v17  ;;  %2464 = vmatpush1.bf16.msra.mxu1 %v3609_v18  ;;  %v3673_v17 = vld [vmem:[%s4992_s7 + $0x278] ss:$28 sps:$4 sm:$0xff]   ;;  %v3677_v18 = vld [vmem:[%s4992_s7 + $0x440] ss:$28 sps:$4 sm:$0xff]  }
 0x2d9   :  { %2359 = vmatprep.subr.bf16.mxu0 %v3614_v19  ;;  %2465 = vmatprep.subr.bf16.mxu1 %v3617_v24  ;;  %v3680_v19 = vld [vmem:[%s4992_s7 + $0x2b4] ss:$28 sps:$4 sm:$0xff]  }
 0x2da   :  { %v3681_v24 = vld [vmem:[%s4992_s7 + $0x638] ss:$28 sps:$4 sm:$0xff]  }
 0x2dc   :  { %2360 = vmatpush1.bf16.msra.mxu0 %v3612_v25  ;;  %2466 = vmatpush1.bf16.msra.mxu1 %v3615_v26  ;;  %v3678_v25 = vld [vmem:[%s4992_s7 + $0x2b0] ss:$28 sps:$4 sm:$0xff]   ;;  %v3682_v26 = vld [vmem:[%s4992_s7 + $0x478] ss:$28 sps:$4 sm:$0xff]  }
 0x2dd   :  { %2488 = vmatprep.subr.bf16.mxu0 %v3620_v27  ;;  %3189 = vmatprep.subr.bf16.mxu1 %v3621_v28  ;;  %v3685_v27 = vld [vmem:[%s4992_s7 + $0x2ec] ss:$28 sps:$4 sm:$0xff]  }
 0x2de   :  { %v3686_v28 = vld [vmem:[%s4992_s7 + $0x670] ss:$28 sps:$4 sm:$0xff]  }
 0x2df   :  { %2362 = vmatmul.mubr.bf16.vlgmr.msra.gmra.mrb[8].mxu0 %v4414_v47  ;;  %2468 = vmatmul.mubr.bf16.vlgmr.msra.gmra.mrb[20].mxu1 %v4414_v47 }
 0x2e0   :  { %2371 = vmatprep.mubr.bf16.mxu0 %v4454_v23  ;;  %2477 = vmatprep.mubr.bf16.mxu1 %v4454_v23 }
 0x2e1   :  { %2489 = vmatpush1.bf16.msra.mxu0 %v3618_v29  ;;  %3190 = vmatpush3.bf16.msra.mxu1 %v3622_v30  ;;  %v3683_v29 = vld [vmem:[%s4992_s7 + $0x2e8] ss:$28 sps:$4 sm:$0xff]   ;;  %v3687_v30 = vld [vmem:[%s4992_s7 + $0x4b0] ss:$28 sps:$4 sm:$0xff]  }
 0x2e2   :  { %2490 = vmatprep.subr.bf16.mxu0 %v3625_v31  ;;  %3191 = vmatprep.subr.bf16.mxu1 %v3626_v32  ;;  %v3690_v31 = vld [vmem:[%s4992_s7 + $0x324] ss:$28 sps:$4 sm:$0xff]  }
 0x2e3   :  { %v3691_v32 = vld [vmem:[%s4992_s7 + $0x6a8] ss:$28 sps:$4 sm:$0xff]  }
 0x2e5   :  { %2491 = vmatpush1.bf16.msra.mxu0 %v3623_v33  ;;  %3192 = vmatpush3.bf16.msra.mxu1 %v3627_v34  ;;  %v3688_v33 = vld [vmem:[%s4992_s7 + $0x320] ss:$28 sps:$4 sm:$0xff]   ;;  %v3692_v34 = vld [vmem:[%s4992_s7 + $0x4e8] ss:$28 sps:$4 sm:$0xff]  }
 0x2e6   :  { %2492 = vmatprep.subr.bf16.mxu0 %v3630_v35  ;;  %3193 = vmatprep.subr.bf16.mxu1 %v3631_v36  ;;  %v3695_v35 = vld [vmem:[%s4992_s7 + $0x35c] ss:$28 sps:$4 sm:$0xff]  }
 0x2e7   :  { %2372 = vmatmul.mubr.bf16.gmra.mrb[12].mxu0 %v4450_v21  ;;  %2478 = vmatmul.mubr.bf16.gmra.mrb[24].mxu1 %v4450_v21  ;;  %v3696_v36 = vld [vmem:[%s4992_s7 + $0x6e0] ss:$28 sps:$4 sm:$0xff]  }
 0x2e8   :  { %2520 = vmatprep.mubr.bf16.mxu0 %v4416_v48  ;;  %2626 = vmatprep.mubr.bf16.mxu1 %v4416_v48  ;;  %v3641_v48 = vld [vmem:[%s4992_s7 + $0x2b8] ss:$28 sps:$4 sm:$0xff]  }
 0x2e9   :  { %2493 = vmatpush1.bf16.msra.mxu0 %v3628_v37  ;;  %3194 = vmatpush3.bf16.msra.mxu1 %v3632_v38  ;;  %v3693_v37 = vld [vmem:[%s4992_s7 + $0x358] ss:$28 sps:$4 sm:$0xff]   ;;  %v3697_v38 = vld [vmem:[%s4992_s7 + $0x520] ss:$28 sps:$4 sm:$0xff]  }
 0x2ea   :  { %2494 = vmatprep.subr.bf16.mxu0 %v3635_v41  ;;  %3195 = vmatprep.subr.bf16.mxu1 %v3636_v43  ;;  %v3700_v41 = vld [vmem:[%s4992_s7 + $0x394] ss:$28 sps:$4 sm:$0xff]  }
 0x2eb   :  { %v3698_v43 = vld [vmem:[%s4992_s7 + $0x390] ss:$28 sps:$4 sm:$0xff]  }
 0x2ed   :  { %2495 = vmatpush1.bf16.msra.mxu0 %v3633_v44  ;;  %3196 = vmatpush3.bf16.msra.mxu1 %v3637_v45  ;;  %v3703_v44 = vld [vmem:[%s4992_s7 + $0x3cc] ss:$28 sps:$4 sm:$0xff]  }
 0x2ee   :  { %2496 = vmatprep.subr.bf16.mxu0 %v3640_v50  ;;  %3197 = vmatprep.subr.bf16.mxu1 %v3641_v48  ;;  %v3701_v45 = vld [vmem:[%s4992_s7 + $0x3c8] ss:$28 sps:$4 sm:$0xff]   ;;  %v3707_v48 = vld [vmem:[%s4992_s7 + $0x438] ss:$28 sps:$4 sm:$0xff]  }
 0x2ef   :  { %v3706_v50 = vld [vmem:[%s4992_s7 + $0x404] ss:$28 sps:$4 sm:$0xff]  }
 0x2f1   :  { %2497 = vmatpush1.bf16.msra.mxu0 %v3638_v51  ;;  %3198 = vmatpush3.bf16.msra.mxu1 %v3642_v52  ;;  %v3712_v51 = vld [vmem:[%s4992_s7 + $0x474] ss:$28 sps:$4 sm:$0xff]  }
 0x2f2   :  { %2498 = vmatprep.subr.bf16.mxu0 %v3645_v53  ;;  %3199 = vmatprep.subr.bf16.mxu1 %v3646_v54  ;;  %v3710_v52 = vld [vmem:[%s4992_s7 + $0x470] ss:$28 sps:$4 sm:$0xff]   ;;  %v3718_v53 = vld [vmem:[%s4992_s7 + $0x4e4] ss:$28 sps:$4 sm:$0xff]  }
 0x2f3   :  { %v3716_v54 = vld [vmem:[%s4992_s7 + $0x4e0] ss:$28 sps:$4 sm:$0xff]  }
 0x2f5   :  { %2499 = vmatpush1.bf16.msra.mxu0 %v3643_v55  ;;  %3200 = vmatpush3.bf16.msra.mxu1 %v3647_v56  ;;  %v3721_v55 = vld [vmem:[%s4992_s7 + $0x51c] ss:$28 sps:$4 sm:$0xff]  }
 0x2f6   :  { %2500 = vmatprep.subr.bf16.mxu0 %v3650_v57  ;;  %3201 = vmatprep.subr.bf16.mxu1 %v3651_v58  ;;  %v3719_v56 = vld [vmem:[%s4992_s7 + $0x518] ss:$28 sps:$4 sm:$0xff]   ;;  %v3722_v58 = vld [vmem:[%s4992_s7 + $0x550] ss:$28 sps:$4 sm:$0xff]  }
 0x2f7   :  { %v3724_v57 = vld [vmem:[%s4992_s7 + $0x554] ss:$28 sps:$4 sm:$0xff]  }
 0x2f9   :  { %2501 = vmatpush1.bf16.msra.mxu0 %v3648_v59  ;;  %3202 = vmatpush3.bf16.msra.mxu1 %v3652_v60  ;;  %v3727_v59 = vld [vmem:[%s4992_s7 + $0x58c] ss:$28 sps:$4 sm:$0xff]  }
 0x2fa   :  { %2502 = vmatprep.subr.bf16.mxu0 %v3655_v61  ;;  %3203 = vmatprep.subr.bf16.mxu1 %v3656_v62  ;;  %v3725_v60 = vld [vmem:[%s4992_s7 + $0x588] ss:$28 sps:$4 sm:$0xff]   ;;  %v3728_v62 = vld [vmem:[%s4992_s7 + $0x5c0] ss:$28 sps:$4 sm:$0xff]  }
 0x2fb   :  { %v3730_v61 = vld [vmem:[%s4992_s7 + $0x5c4] ss:$28 sps:$4 sm:$0xff]  }
 0x2fd   :  { %2503 = vmatpush1.bf16.msra.mxu0 %v3653_v63  ;;  %3204 = vmatpush3.bf16.msra.mxu1 %v3657_v0  ;;  %v3733_v63 = vld [vmem:[%s4992_s7 + $0x5fc] ss:$28 sps:$4 sm:$0xff]  }
 0x2fe   :  { %2504 = vmatprep.subr.bf16.mxu0 %v3660_v1  ;;  %3217 = vmatprep.subr.bf16.mxu1 %v3661_v2  ;;  %v3731_v0 = vld [vmem:[%s4992_s7 + $0x5f8] ss:$28 sps:$4 sm:$0xff]   ;;  %v3734_v2 = vld [vmem:[%s4992_s7 + $0x630] ss:$28 sps:$4 sm:$0xff]  }
 0x2ff   :  { %v3736_v1 = vld [vmem:[%s4992_s7 + $0x634] ss:$28 sps:$4 sm:$0xff]  }
 0x300   :  { %2627 = vmatmul.mubr.bf16.vlgmr.msra.gmra.mrb[28].mxu1 %v4412_v46 }
 0x301   :  { %2505 = vmatpush1.bf16.msra.mxu0 %v3658_v3  ;;  %2634 = vmatprep.mubr.bf16.mxu1 %v4452_v22  ;;  %v3739_v3 = vld [vmem:[%s4992_s7 + $0x66c] ss:$28 sps:$4 sm:$0xff]  }
 0x302   :  { %3218 = vmatpush3.bf16.msra.mxu1 %v3662_v4  ;;  %2506 = vmatprep.subr.bf16.mxu0 %v3665_v5  ;;  %v3737_v4 = vld [vmem:[%s4992_s7 + $0x668] ss:$28 sps:$4 sm:$0xff]  }
 0x303   :  { %3219 = vmatprep.subr.bf16.mxu1 %v3666_v6  ;;  %v3742_v5 = vld [vmem:[%s4992_s7 + $0x6a4] ss:$28 sps:$4 sm:$0xff]  }
 0x304   :  { %v3740_v6 = vld [vmem:[%s4992_s7 + $0x6a0] ss:$28 sps:$4 sm:$0xff]  }
 0x305   :  { %2507 = vmatpush1.bf16.msra.mxu0 %v3663_v7  ;;  %v3745_v7 = vld [vmem:[%s4992_s7 + $0x6dc] ss:$28 sps:$4 sm:$0xff]  }
 0x306   :  { %3220 = vmatpush3.bf16.msra.mxu1 %v3667_v8  ;;  %2508 = vmatprep.subr.bf16.mxu0 %v3670_v9  ;;  %v3743_v8 = vld [vmem:[%s4992_s7 + $0x6d8] ss:$28 sps:$4 sm:$0xff]   ;;  %v4937_v9 = vld [vmem:[%s4993_s8] sm:$0x7f] }
 0x307   :  { %3221 = vmatprep.subr.bf16.mxu1 %v3671_v10  ;;  %v1092_v10 = vrot.slane %v4937_v9, %v4199_v40 }
 0x308   :  { %2635 = vmatmul.mubr.bf16.gmra.mrb[32].mxu1 %v4448_v20 }
 0x309   :  { %2509 = vmatpush1.bf16.msra.mxu0 %v3668_v11  ;;  %2675 = vmatprep.mubr.bf16.mxu1 %v4418_v49  ;;  %v4944_v11 = vrot.slane %v4937_v9, %v371_v12 }
 0x30a   :  { %3222 = vmatpush3.bf16.msra.mxu1 %v3672_v13  ;;  %2510 = vmatprep.subr.bf16.mxu0 %v3675_v15 }
 0x30b   :  { %3223 = vmatprep.subr.bf16.mxu1 %v3676_v16 }
 0x30d   :  { %2511 = vmatpush1.bf16.msra.mxu0 %v3673_v17 }
 0x30e   :  { %3224 = vmatpush3.bf16.msra.mxu1 %v3677_v18  ;;  %2512 = vmatprep.subr.bf16.mxu0 %v3680_v19 }
 0x30f   :  { %3225 = vmatprep.subr.bf16.mxu1 %v3681_v24 }
 0x311   :  { %2513 = vmatpush1.bf16.msra.mxu0 %v3678_v25 }
 0x312   :  { %3226 = vmatpush3.bf16.msra.mxu1 %v3682_v26  ;;  %2514 = vmatprep.subr.bf16.mxu0 %v3685_v27 }
 0x313   :  { %3227 = vmatprep.subr.bf16.mxu1 %v3686_v28 }
 0x315   :  { %2515 = vmatpush1.bf16.msra.mxu0 %v3683_v29 }
 0x316   :  { %3228 = vmatpush3.bf16.msra.mxu1 %v3687_v30  ;;  %2516 = vmatprep.subr.bf16.mxu0 %v3690_v31 }
 0x317   :  { %3229 = vmatprep.subr.bf16.mxu1 %v3691_v32 }
 0x319   :  { %2517 = vmatpush1.bf16.msra.mxu0 %v3688_v33 }
 0x31a   :  { %3230 = vmatpush3.bf16.msra.mxu1 %v3692_v34  ;;  %2518 = vmatprep.subr.bf16.mxu0 %v3695_v35 }
 0x31b   :  { %3231 = vmatprep.subr.bf16.mxu1 %v3696_v36 }
 0x31d   :  { %2519 = vmatpush1.bf16.msra.mxu0 %v3693_v37 }
 0x31e   :  { %3232 = vmatpush3.bf16.msra.mxu1 %v3697_v38  ;;  %2541 = vmatprep.subr.bf16.mxu0 %v3700_v41 }
 0x320   :  { %2521 = vmatmul.mubr.bf16.vlgmr.msra.gmra.mrb[16].mxu0 %v4412_v46  ;;  %v3704_v46 = vld [vmem:[%s4992_s7 + $0x400] ss:$28 sps:$4 sm:$0xff]  }
 0x321   :  { %2676 = vmatmul.mubr.bf16.vlgmr.msra.gmra.mrb[36].mxu1 %v4414_v47  ;;  %2530 = vmatprep.mubr.bf16.mxu0 %v4452_v22  ;;  %v3709_v22 = vld [vmem:[%s4992_s7 + $0x43c] ss:$28 sps:$4 sm:$0xff]  }
 0x322   :  { %2542 = vmatpush1.bf16.msra.mxu0 %v3698_v43  ;;  %2683 = vmatprep.mubr.bf16.mxu1 %v4454_v23 }
 0x323   :  { %2543 = vmatprep.subr.bf16.mxu0 %v3703_v44 }
 0x326   :  { %2544 = vmatpush1.bf16.msra.mxu0 %v3701_v45 }
 0x327   :  { %2545 = vmatprep.subr.bf16.mxu0 %v3706_v50 }
 0x328   :  { %2531 = vmatmul.mubr.bf16.gmra.mrb[20].mxu0 %v4448_v20  ;;  %v3713_v20 = vld [vmem:[%s4992_s7 + $0x4a8] ss:$28 sps:$4 sm:$0xff]  }
 0x329   :  { %2684 = vmatmul.mubr.bf16.gmra.mrb[40].mxu1 %v4450_v21  ;;  %2573 = vmatprep.mubr.bf16.mxu0 %v4418_v49  ;;  %v3715_v49 = vld [vmem:[%s4992_s7 + $0x4ac] ss:$28 sps:$4 sm:$0xff]   ;;  %s3883_s7 = smov [#allocation2]  }
 0x32a   :  { %2546 = vmatpush1.bf16.msra.mxu0 %v3704_v46  ;;  %s2866_s8 = sshll.u32 %s3883_s7, 4  ;;  %s2867_s8 = int_to_ptr.vmem [resolvable:$true] %s2866_s8 }
 0x32b   :  { %2547 = vmatprep.subr.bf16.mxu0 %v3709_v22  ;;  %s3858_s14 = scalar_lea.vmem %s2867_s8, 3584  ;;  %p3863_p1 = scmp.lt.s32.totalorder %s2867_s8, %s2867_s8 }
 0x32c   :  { %p3859_p0 = scmp.ne.s32.totalorder %s2867_s8, %s3858_s14  ;;  %p3864_p2 = scmp.lt.s32.totalorder %s3858_s14, %s3858_s14 }
 0x32e   :  { %2548 = vmatpush1.bf16.msra.mxu0 %v3707_v48  ;;  %p3865_p3 = por %p3864_p2, %p3863_p1 }
 0x32f   :  { %2549 = vmatprep.subr.bf16.mxu0 %v3712_v51 }
 0x330   :  { %p3866_p4 = pnand %p3865_p3, %p3859_p0 }
 0x332   :  { %2550 = vmatpush1.bf16.msra.mxu0 %v3710_v52 }
 0x333   :  { %2551 = vmatprep.subr.bf16.mxu0 %v3715_v49 }
 0x336   :  { %2552 = vmatpush1.bf16.msra.mxu0 %v3713_v20 }
 0x337   :  { %2553 = vmatprep.subr.bf16.mxu0 %v3718_v53 }
 0x33a   :  { %2554 = vmatpush1.bf16.msra.mxu0 %v3716_v54 }
 0x33b   :  { %2555 = vmatprep.subr.bf16.mxu0 %v3721_v55 }
 0x33e   :  { %2556 = vmatpush1.bf16.msra.mxu0 %v3719_v56 }
 0x33f   :  { %2557 = vmatprep.subr.bf16.mxu0 %v3724_v57 }
 0x342   :  { %2558 = vmatpush1.bf16.msra.mxu0 %v3722_v58 }
 0x343   :  { %2559 = vmatprep.subr.bf16.mxu0 %v3727_v59 }
 0x346   :  { %2560 = vmatpush1.bf16.msra.mxu0 %v3725_v60 }
 0x347   :  { %2561 = vmatprep.subr.bf16.mxu0 %v3730_v61 }
 0x34a   :  { %2562 = vmatpush1.bf16.msra.mxu0 %v3728_v62 }
 0x34b   :  { %2563 = vmatprep.subr.bf16.mxu0 %v3733_v63 }
 0x34e   :  { %2564 = vmatpush1.bf16.msra.mxu0 %v3731_v0 }
 0x34f   :  { %2565 = vmatprep.subr.bf16.mxu0 %v3736_v1 }
 0x352   :  { %2566 = vmatpush1.bf16.msra.mxu0 %v3734_v2 }
 0x353   :  { %2567 = vmatprep.subr.bf16.mxu0 %v3739_v3 }
 0x356   :  { %2568 = vmatpush1.bf16.msra.mxu0 %v3737_v4 }
 0x357   :  { %2569 = vmatprep.subr.bf16.mxu0 %v3742_v5 }
 0x35a   :  { %2570 = vmatpush1.bf16.msra.mxu0 %v3740_v6 }
 0x35b   :  { %2571 = vmatprep.subr.bf16.mxu0 %v3745_v7 }
 0x35e   :  { %2572 = vmatpush1.bf16.msra.mxu0 %v3743_v8 }
 0x361   :  { %2574 = vmatmul.mubr.bf16.vlgmr.msra.gmra.mrb[16].mxu0 %v4414_v47  ;;  %v4948_v47 = vrot.slane %v4937_v9, %v4205_v42 }
 0x362   :  { %2583 = vmatprep.mubr.bf16.mxu0 %v4454_v23 }
 0x369   :  { %2584 = vmatmul.mubr.bf16.gmra.mrb[20].mxu0 %v4450_v21  ;;  %v4953_v21 = vrot.slane %v4937_v9, %v375_v14 }
 0x3b2   :  { %v2363_v23 = vpop.f32.mrb[8].mxu0  ;;  %v2469_v13 = vpop.f32.mrb[20].mxu1 }
 0x3b3   :  { %v3251_v15 = vadd.f32 %v2363_v23, %v1092_v10  ;;  %v3259_v16 = vadd.f32 %v2469_v13, %v4944_v11  ;;  %v2365_v40 = vpop.f32.mrb[9].mxu0  ;;  %v2471_v17 = vpop.f32.mrb[21].mxu1 }
 0x3b4   :  { %v3252_v18 = vadd.f32 %v2365_v40, %v4948_v47  ;;  %v3260_v12 = vadd.f32 %v2471_v17, %v4953_v21  ;;  %v2367_v19 = vpop.f32.mrb[10].mxu0  ;;  %v2473_v24 = vpop.f32.mrb[22].mxu1 }
 0x3b5   :  { %v2692_v42 = vsub.f32 0.0, %v3251_v15  ;;  %v2694_v25 = vsub.f32 0.0, %v3259_v16  ;;  %v3253_v26 = vadd.f32 %v2367_v19, %v1092_v10  ;;  %v3261_v27 = vadd.f32 %v2473_v24, %v4944_v11  ;;  %v2369_v14 = vpop.f32.mrb[11].mxu0  ;;  %v2475_v28 = vpop.f32.mrb[23].mxu1 }
 0x3b6   :  { %v2693_v29 = vsub.f32 0.0, %v3252_v18  ;;  %v2695_v30 = vsub.f32 0.0, %v3260_v12  ;;  %v3254_v31 = vadd.f32 %v2369_v14, %v4948_v47  ;;  %v3262_v32 = vadd.f32 %v2475_v28, %v4953_v21 }
 0x3b7   :  { %v2720_v33 = vmul.f32 1.442695, %v2692_v42  ;;  %v2724_v34 = vmul.f32 1.442695, %v2694_v25  ;;  %v2699_v35 = vsub.f32 0.0, %v3253_v26  ;;  %v2701_v36 = vsub.f32 0.0, %v3261_v27 }
 0x3b8   :  { %v2722_v37 = vmul.f32 1.442695, %v2693_v29  ;;  %v2726_v38 = vmul.f32 1.442695, %v2695_v30  ;;  %v2700_v41 = vsub.f32 0.0, %v3254_v31  ;;  %v2702_v43 = vsub.f32 0.0, %v3262_v32 }
 0x3b9   :  { %3746 = vpow2.f32 %v2720_v33  ;;  %v2734_v44 = vmul.f32 1.442695, %v2699_v35  ;;  %v2738_v45 = vmul.f32 1.442695, %v2701_v36 }
 0x3ba   :  { %3748 = vpow2.f32 %v2724_v34  ;;  %v2373_v50 = vpop.f32.mrb[12].mxu0  ;;  %v2479_v46 = vpop.f32.mrb[24].mxu1  ;;  %v2736_v22 = vmul.f32 1.442695, %v2700_v41  ;;  %v2740_v20 = vmul.f32 1.442695, %v2702_v43 }
 0x3bb   :  { %3750 = vpow2.f32 %v2722_v37  ;;  %v3255_v48 = vadd.f32 %v2373_v50, %v1092_v10  ;;  %v3263_v51 = vadd.f32 %v2479_v46, %v4944_v11  ;;  %v2375_v52 = vpop.f32.mrb[13].mxu0  ;;  %v2481_v49 = vpop.f32.mrb[25].mxu1 }
 0x3bc   :  { %3752 = vpow2.f32 %v2726_v38  ;;  %v3256_v53 = vadd.f32 %v2375_v52, %v4948_v47  ;;  %v3264_v54 = vadd.f32 %v2481_v49, %v4953_v21  ;;  %v2377_v55 = vpop.f32.mrb[14].mxu0  ;;  %v2483_v56 = vpop.f32.mrb[26].mxu1 }
 0x3bd   :  { %3754 = vpow2.f32 %v2734_v44  ;;  %v2706_v57 = vsub.f32 0.0, %v3255_v48  ;;  %v2708_v58 = vsub.f32 0.0, %v3263_v51  ;;  %v3257_v59 = vadd.f32 %v2377_v55, %v1092_v10  ;;  %v2379_v60 = vpop.f32.mrb[15].mxu0  ;;  %v2485_v61 = vpop.f32.mrb[27].mxu1 }
 0x3be   :  { %3756 = vpow2.f32 %v2738_v45  ;;  %v2707_v62 = vsub.f32 0.0, %v3256_v53  ;;  %v2709_v63 = vsub.f32 0.0, %v3264_v54  ;;  %v3265_v17 = vadd.f32 %v2483_v56, %v4944_v11 }
 0x3bf   :  { %3758 = vpow2.f32 %v2736_v22  ;;  %v2748_v0 = vmul.f32 1.442695, %v2706_v57  ;;  %v2752_v1 = vmul.f32 1.442695, %v2708_v58  ;;  %v2713_v2 = vsub.f32 0.0, %v3257_v59 }
 0x3c0   :  { %3760 = vpow2.f32 %v2740_v20  ;;  %v2750_v3 = vmul.f32 1.442695, %v2707_v62  ;;  %v2754_v4 = vmul.f32 1.442695, %v2709_v63  ;;  %v3258_v19 = vadd.f32 %v2379_v60, %v4948_v47 }
 0x3c1   :  { %3762 = vpow2.f32 %v2748_v0  ;;  %v2762_v5 = vmul.f32 1.442695, %v2713_v2  ;;  %v3266_v25 = vadd.f32 %v2485_v61, %v4953_v21  ;;  %v2715_v29 = vsub.f32 0.0, %v3265_v17 }
 0x3c2   :  { %3764 = vpow2.f32 %v2752_v1  ;;  %v2714_v31 = vsub.f32 0.0, %v3258_v19 }
 0x3c3   :  { %v3747_v6 = vpop.eup %3746  ;;  %3766 = vpow2.f32 %v2750_v3  ;;  %v2716_v47 = vsub.f32 0.0, %v3266_v25  ;;  %v2766_v37 = vmul.f32 1.442695, %v2715_v29 }
 0x3c4   :  { %v3749_v7 = vpop.eup %3748  ;;  %v2776_v8 = vadd.f32 1.0, %v3747_v6  ;;  %3768 = vpow2.f32 %v2754_v4  ;;  %v2764_v43 = vmul.f32 1.442695, %v2714_v31 }
 0x3c5   :  { %v3751_v10 = vpop.eup %3750  ;;  %v2778_v23 = vadd.f32 1.0, %v3749_v7  ;;  %3770 = vpow2.f32 %v2762_v5  ;;  %v2768_v45 = vmul.f32 1.442695, %v2716_v47 }
 0x3c6   :  { %v3753_v13 = vpop.eup %3752  ;;  %3772 = vrcp.f32 %v2776_v8  ;;  %v2777_v15 = vadd.f32 1.0, %v3751_v10 }
 0x3c7   :  { %v3755_v16 = vpop.eup %3754  ;;  %3774 = vrcp.f32 %v2778_v23  ;;  %v2779_v40 = vadd.f32 1.0, %v3753_v13 }
 0x3c8   :  { %v3757_v18 = vpop.eup %3756  ;;  %3776 = vrcp.f32 %v2777_v15  ;;  %v2783_v12 = vadd.f32 1.0, %v3755_v16  ;;  %v1115_v16 = vsub.s32 6, %v4196_v39 }
 0x3c9   :  { %v3759_v24 = vpop.eup %3758  ;;  %3778 = vrcp.f32 %v2779_v40  ;;  %v2785_v42 = vadd.f32 1.0, %v3757_v18 }
 0x3ca   :  { %v3761_v26 = vpop.eup %3760  ;;  %3780 = vrcp.f32 %v2783_v12  ;;  %v2784_v27 = vadd.f32 1.0, %v3759_v24  ;;  %v1116_v40 = vrot.slane %v4937_v9, %v1115_v16 }
 0x3cb   :  { %v3763_v14 = vpop.eup %3762  ;;  %3782 = vrcp.f32 %v2785_v42  ;;  %v2786_v28 = vadd.f32 1.0, %v3761_v26 }
 0x3cc   :  { %v3765_v30 = vpop.eup %3764  ;;  %3784 = vrcp.f32 %v2784_v27  ;;  %v2790_v11 = vadd.f32 1.0, %v3763_v14 }
 0x3cd   :  { %v3767_v32 = vpop.eup %3766  ;;  %3786 = vrcp.f32 %v2786_v28  ;;  %v2792_v33 = vadd.f32 1.0, %v3765_v30 }
 0x3ce   :  { %v3769_v34 = vpop.eup %3768  ;;  %3788 = vrcp.f32 %v2790_v11  ;;  %v2791_v35 = vadd.f32 1.0, %v3767_v32 }
 0x3cf   :  { %v3771_v36 = vpop.eup %3770  ;;  %3790 = vrcp.f32 %v2792_v33  ;;  %v2793_v21 = vadd.f32 1.0, %v3769_v34 }
 0x3d0   :  { %v3773_v38 = vpop.eup %3772  ;;  %3792 = vrcp.f32 %v2791_v35  ;;  %v2797_v41 = vadd.f32 1.0, %v3771_v36 }
 0x3d1   :  { %v3775_v44 = vpop.eup %3774  ;;  %2832 = vst [vmem:[#allocation2] sm:$0xff] %v3773_v38  ;;  %3794 = vrcp.f32 %v2793_v21 }
 0x3d2   :  { %v3777_v50 = vpop.eup %3776  ;;  %2834 = vst [vmem:[#allocation2 + $0x10] sm:$0xff] %v3775_v44  ;;  %3796 = vrcp.f32 %v2797_v41 }
 0x3d3   :  { %v3779_v46 = vpop.eup %3778  ;;  %2833 = vst [vmem:[#allocation2 + $0x8] sm:$0xff] %v3777_v50  ;;  %3798 = vpow2.f32 %v2766_v37  ;;  %v3205_v22 = vpop.f32.mrb[28].mxu1 }
 0x3d4   :  { %v3781_v48 = vpop.eup %3780  ;;  %2835 = vst [vmem:[#allocation2 + $0x18] sm:$0xff] %v3779_v46  ;;  %3800 = vpow2.f32 %v2764_v43  ;;  %v3206_v51 = vpop.f32.mrb[29].mxu1 }
 0x3d5   :  { %v3783_v52 = vpop.eup %3782  ;;  %2840 = vst [vmem:[#allocation2 + $0x38] sm:$0xff] %v3781_v48  ;;  %3802 = vpow2.f32 %v2768_v45  ;;  %v3207_v49 = vadd.f32 %v3206_v51, %v3205_v22  ;;  %v3208_v20 = vpop.f32.mrb[30].mxu1 }
 0x3d6   :  { %v3785_v53 = vpop.eup %3784  ;;  %2842 = vst [vmem:[#allocation2 + $0x48] sm:$0xff] %v3783_v52  ;;  %v3209_v54 = vpop.f32.mrb[31].mxu1 }
 0x3d7   :  { %v3787_v55 = vpop.eup %3786  ;;  %2841 = vst [vmem:[#allocation2 + $0x40] sm:$0xff] %v3785_v53  ;;  %v3210_v56 = vadd.f32 %v3209_v54, %v3208_v20  ;;  %v2629_v12 = vadd.f32 %v3207_v49, %v1116_v40 }
 0x3d8   :  { %v3789_v57 = vpop.eup %3788  ;;  %2843 = vst [vmem:[#allocation2 + $0x50] sm:$0xff] %v3787_v55 }
 0x3d9   :  { %v3791_v58 = vpop.eup %3790  ;;  %2847 = vst [vmem:[#allocation2 + $0x70] sm:$0xff] %v3789_v57  ;;  %v2632_v25 = vadd.f32 %v3210_v56, %v1116_v40  ;;  %v1107_v57 = vsub.s32 4, %v4196_v39 }
 0x3da   :  { %v3793_v59 = vpop.eup %3792  ;;  %2849 = vst [vmem:[#allocation2 + $0x80] sm:$0xff] %v3791_v58  ;;  %v1111_v58 = vsub.s32 5, %v4196_v39 }
 0x3db   :  { %v3795_v60 = vpop.eup %3794  ;;  %2848 = vst [vmem:[#allocation2 + $0x78] sm:$0xff] %v3793_v59  ;;  %v3211_v61 = vpop.f32.mrb[32].mxu1  ;;  %v1108_v59 = vrot.slane %v4937_v9, %v1107_v57 }
 0x3dc   :  { %v3797_v62 = vpop.eup %3796  ;;  %2850 = vst [vmem:[#allocation2 + $0x88] sm:$0xff] %v3795_v60  ;;  %v3212_v63 = vpop.f32.mrb[33].mxu1  ;;  %v1112_v60 = vrot.slane %v4937_v9, %v1111_v58 }
 0x3dd   :  { %v3799_v0 = vpop.eup %3798  ;;  %2854 = vst [vmem:[#allocation2 + $0xa8] sm:$0xff] %v3797_v62  ;;  %v3213_v1 = vadd.f32 %v3212_v63, %v3211_v61  ;;  %v3214_v2 = vpop.f32.mrb[34].mxu1 }
 0x3de   :  { %v3801_v3 = vpop.eup %3800  ;;  %v2799_v4 = vadd.f32 1.0, %v3799_v0  ;;  %v3215_v5 = vpop.f32.mrb[35].mxu1 }
 0x3df   :  { %v3803_v6 = vpop.eup %3802  ;;  %v2798_v7 = vadd.f32 1.0, %v3801_v3  ;;  %v3216_v8 = vadd.f32 %v3215_v5, %v3214_v2  ;;  %v2637_v32 = vadd.f32 %v3213_v1, %v1116_v40 }
 0x3e0   :  { %3804 = vrcp.f32 %v2799_v4  ;;  %v2800_v10 = vadd.f32 1.0, %v3803_v6 }
 0x3e1   :  { %3806 = vrcp.f32 %v2798_v7  ;;  %v2640_v36 = vadd.f32 %v3216_v8, %v1116_v40 }
 0x3e2   :  { %3808 = vrcp.f32 %v2800_v10 }
 0x3ea   :  { %v3805_v23 = vpop.eup %3804 }
 0x3eb   :  { %v3807_v13 = vpop.eup %3806  ;;  %2856 = vst [vmem:[#allocation2 + $0xb8] sm:$0xff] %v3805_v23 }
 0x3ec   :  { %v3809_v15 = vpop.eup %3808  ;;  %2855 = vst [vmem:[#allocation2 + $0xb0] sm:$0xff] %v3807_v13 }
 0x3ed   :  { %2857 = vst [vmem:[#allocation2 + $0xc0] sm:$0xff] %v3809_v15 }
 0x3f4   :  { %v3233_v17 = vpop.f32.mrb[36].mxu1 }
 0x3f5   :  { %v3234_v18 = vpop.f32.mrb[37].mxu1 }
 0x3f6   :  { %v3235_v19 = vadd.f32 %v3234_v18, %v3233_v17  ;;  %v3236_v24 = vpop.f32.mrb[38].mxu1 }
 0x3f7   :  { %v3237_v42 = vpop.f32.mrb[39].mxu1 }
 0x3f8   :  { %v2678_v26 = vadd.f32 %v3235_v19, %v2629_v12  ;;  %v3238_v27 = vadd.f32 %v3237_v42, %v3236_v24 }
 0x3fa   :  { %v2698_v14 = vsub.f32 0.0, %v2678_v26  ;;  %v2681_v28 = vadd.f32 %v3238_v27, %v2632_v25 }
 0x3fc   :  { %v2732_v29 = vmul.f32 1.442695, %v2698_v14  ;;  %v2705_v30 = vsub.f32 0.0, %v2681_v28  ;;  %v3239_v11 = vpop.f32.mrb[40].mxu1 }
 0x3fd   :  { %v3240_v31 = vpop.f32.mrb[41].mxu1 }
 0x3fe   :  { %3810 = vpow2.f32 %v2732_v29  ;;  %v2746_v33 = vmul.f32 1.442695, %v2705_v30  ;;  %v3241_v47 = vadd.f32 %v3240_v31, %v3239_v11  ;;  %v3242_v34 = vpop.f32.mrb[42].mxu1 }
 0x3ff   :  { %v3243_v35 = vpop.f32.mrb[43].mxu1 }
 0x400   :  { %3812 = vpow2.f32 %v2746_v33  ;;  %v2686_v21 = vadd.f32 %v3241_v47, %v2637_v32  ;;  %v3244_v37 = vadd.f32 %v3243_v35, %v3242_v34 }
 0x402   :  { %v2712_v38 = vsub.f32 0.0, %v2686_v21  ;;  %v2689_v41 = vadd.f32 %v3244_v37, %v2640_v36 }
 0x404   :  { %v2760_v43 = vmul.f32 1.442695, %v2712_v38  ;;  %v2719_v44 = vsub.f32 0.0, %v2689_v41 }
 0x406   :  { %3814 = vpow2.f32 %v2760_v43  ;;  %v2774_v45 = vmul.f32 1.442695, %v2719_v44 }
 0x408   :  { %v3811_v50 = vpop.eup %3810  ;;  %3816 = vpow2.f32 %v2774_v45 }
 0x409   :  { %v2782_v46 = vadd.f32 1.0, %v3811_v50 }
 0x40a   :  { %v3813_v22 = vpop.eup %3812 }
 0x40b   :  { %3818 = vrcp.f32 %v2782_v46  ;;  %v2789_v48 = vadd.f32 1.0, %v3813_v22 }
 0x40d   :  { %3820 = vrcp.f32 %v2789_v48 }
 0x410   :  { %v3815_v51 = vpop.eup %3814 }
 0x411   :  { %v2796_v52 = vadd.f32 1.0, %v3815_v51 }
 0x412   :  { %v3817_v49 = vpop.eup %3816 }
 0x413   :  { %3822 = vrcp.f32 %v2796_v52  ;;  %v2803_v20 = vadd.f32 1.0, %v3817_v49 }
 0x415   :  { %v3819_v53 = vpop.eup %3818  ;;  %3824 = vrcp.f32 %v2803_v20 }
 0x416   :  { %2839 = vst.msk [vmem:[#allocation2 + $0x30] sm:$0xff] %vm2838_vm2, %v3819_v53 }
 0x417   :  { %v3821_v54 = vpop.eup %3820 }
 0x418   :  { %2846 = vst.msk [vmem:[#allocation2 + $0x68] sm:$0xff] %vm2838_vm2, %v3821_v54 }
 0x41d   :  { %v3823_v55 = vpop.eup %3822 }
 0x41e   :  { %2853 = vst.msk [vmem:[#allocation2 + $0xa0] sm:$0xff] %vm2838_vm2, %v3823_v55 }
 0x41f   :  { %v3825_v56 = vpop.eup %3824 }
 0x420   :  { %2860 = vst.msk [vmem:[#allocation2 + $0xd8] sm:$0xff] %vm2838_vm2, %v3825_v56 }
 0x434   :  { %v2575_v61 = vpop.f32.mrb[16].mxu0 }
 0x435   :  { %v3267_v62 = vadd.f32 %v2575_v61, %v1108_v59  ;;  %v2577_v63 = vpop.f32.mrb[17].mxu0 }
 0x436   :  { %v3268_v0 = vadd.f32 %v2577_v63, %v1112_v60  ;;  %v2579_v1 = vpop.f32.mrb[18].mxu0 }
 0x437   :  { %v2696_v2 = vsub.f32 0.0, %v3267_v62  ;;  %v3269_v3 = vadd.f32 %v2579_v1, %v1108_v59  ;;  %v2581_v4 = vpop.f32.mrb[19].mxu0 }
 0x438   :  { %v2697_v5 = vsub.f32 0.0, %v3268_v0  ;;  %v3270_v6 = vadd.f32 %v2581_v4, %v1112_v60 }
 0x439   :  { %v2728_v7 = vmul.f32 1.442695, %v2696_v2  ;;  %v2703_v8 = vsub.f32 0.0, %v3269_v3 }
 0x43a   :  { %v2730_v10 = vmul.f32 1.442695, %v2697_v5  ;;  %v2704_v23 = vsub.f32 0.0, %v3270_v6 }
 0x43b   :  { %3826 = vpow2.f32 %v2728_v7  ;;  %v2742_v39 = vmul.f32 1.442695, %v2703_v8 }
 0x43c   :  { %3828 = vpow2.f32 %v2730_v10  ;;  %v2744_v13 = vmul.f32 1.442695, %v2704_v23  ;;  %v2585_v15 = vpop.f32.mrb[20].mxu0 }
 0x43d   :  { %3830 = vpow2.f32 %v2742_v39  ;;  %v3271_v9 = vadd.f32 %v2585_v15, %v1108_v59  ;;  %v2587_v16 = vpop.f32.mrb[21].mxu0 }
 0x43e   :  { %3832 = vpow2.f32 %v2744_v13  ;;  %v3272_v40 = vadd.f32 %v2587_v16, %v1112_v60  ;;  %v2589_v17 = vpop.f32.mrb[22].mxu0 }
 0x43f   :  { %v2710_v18 = vsub.f32 0.0, %v3271_v9  ;;  %v3273_v12 = vadd.f32 %v2589_v17, %v1108_v59  ;;  %v2591_v19 = vpop.f32.mrb[23].mxu0 }
 0x440   :  { %v2711_v24 = vsub.f32 0.0, %v3272_v40  ;;  %v3274_v42 = vadd.f32 %v2591_v19, %v1112_v60 }
 0x441   :  { %v2756_v25 = vmul.f32 1.442695, %v2710_v18  ;;  %v2717_v26 = vsub.f32 0.0, %v3273_v12 }
 0x442   :  { %v2758_v27 = vmul.f32 1.442695, %v2711_v24  ;;  %v2718_v14 = vsub.f32 0.0, %v3274_v42 }
 0x443   :  { %3834 = vpow2.f32 %v2756_v25  ;;  %v2770_v28 = vmul.f32 1.442695, %v2717_v26 }
 0x444   :  { %3836 = vpow2.f32 %v2758_v27  ;;  %v2772_v29 = vmul.f32 1.442695, %v2718_v14 }
 0x445   :  { %v3827_v30 = vpop.eup %3826  ;;  %3838 = vpow2.f32 %v2770_v28 }
 0x446   :  { %v3829_v11 = vpop.eup %3828  ;;  %v2780_v31 = vadd.f32 1.0, %v3827_v30  ;;  %3840 = vpow2.f32 %v2772_v29 }
 0x447   :  { %v3831_v32 = vpop.eup %3830  ;;  %v2781_v33 = vadd.f32 1.0, %v3829_v11 }
 0x448   :  { %v3833_v47 = vpop.eup %3832  ;;  %3842 = vrcp.f32 %v2780_v31  ;;  %v2787_v34 = vadd.f32 1.0, %v3831_v32 }
 0x449   :  { %3844 = vrcp.f32 %v2781_v33  ;;  %v2788_v35 = vadd.f32 1.0, %v3833_v47 }
 0x44a   :  { %3846 = vrcp.f32 %v2787_v34 }
 0x44b   :  { %3848 = vrcp.f32 %v2788_v35 }
 0x44d   :  { %v3835_v36 = vpop.eup %3834 }
 0x44e   :  { %v3837_v21 = vpop.eup %3836  ;;  %v2794_v37 = vadd.f32 1.0, %v3835_v36 }
 0x44f   :  { %v3839_v38 = vpop.eup %3838  ;;  %v2795_v41 = vadd.f32 1.0, %v3837_v21 }
 0x450   :  { %v3841_v43 = vpop.eup %3840  ;;  %3850 = vrcp.f32 %v2794_v37  ;;  %v2801_v44 = vadd.f32 1.0, %v3839_v38 }
 0x451   :  { %3852 = vrcp.f32 %v2795_v41  ;;  %v2802_v45 = vadd.f32 1.0, %v3841_v43 }
 0x452   :  { %v3843_v50 = vpop.eup %3842  ;;  %3854 = vrcp.f32 %v2801_v44 }
 0x453   :  { %v3845_v46 = vpop.eup %3844  ;;  %2836 = vst [vmem:[#allocation2 + $0x20] sm:$0xff] %v3843_v50  ;;  %3856 = vrcp.f32 %v2802_v45 }
 0x454   :  { %v3847_v22 = vpop.eup %3846  ;;  %2837 = vst [vmem:[#allocation2 + $0x28] sm:$0xff] %v3845_v46 }
 0x455   :  { %v3849_v48 = vpop.eup %3848  ;;  %2844 = vst [vmem:[#allocation2 + $0x58] sm:$0xff] %v3847_v22 }
 0x456   :  { %2845 = vst [vmem:[#allocation2 + $0x60] sm:$0xff] %v3849_v48 }
 0x45a   :  { %v3851_v51 = vpop.eup %3850 }
 0x45b   :  { %v3853_v52 = vpop.eup %3852  ;;  %2851 = vst [vmem:[#allocation2 + $0x90] sm:$0xff] %v3851_v51 }
 0x45c   :  { %v3855_v49 = vpop.eup %3854  ;;  %2852 = vst [vmem:[#allocation2 + $0x98] sm:$0xff] %v3853_v52 }
 0x45d   :  { %v3857_v20 = vpop.eup %3856  ;;  %2858 = vst [vmem:[#allocation2 + $0xc8] sm:$0xff] %v3855_v49 }
 0x45e   :  { %2859 = vst [vmem:[#allocation2 + $0xd0] sm:$0xff] %v3857_v20 }
 0x45f   :  { %3869 = shalt.err (!%p3866_p4)
}
 0x460   :  { %s3870_s17 = scalar_lea.hbm %s4994_s9, 3584 }
 0x461   :  { %p3871_p5 = scmp.ne.s32.totalorder %s4994_s9, %s3870_s17  ;;  %p3874_p6 = scmp.lt.u32.totalorder %s3870_s17, %s4994_s9 }
 0x463   :  { %p3876_p7 = pnand %p3874_p6, %p3871_p5 }
 0x465   :  { %3879 = shalt.err (!%p3876_p7)
}
 0x466   :  { %s3884_s21 = smov 896   ;;  %s3885_s0 = smov 56  }
 0x467   :  { %2872 = dma.vmem_to_hbm [thread:$0]  %s2867_s8, 3584, %s4994_s9, [#allocation3], %s3884_s21, %s3884_s21, %s3885_s0  }
 0x468   :  { %3880 = dma.done.wait [#allocation3], 3584  }
 0x469   :  { %3881 = vsyncadd [#allocation3], 4294963712 }
 0x46a   :  { %2876 = vsyncpa [#allocation3], 1 }

</bundles_post_ra>
